<compile_context>
chip_gen: v5e
topology: v5e:2x2
jax: 0.10.0
libtpu: 0.0.40
codegen_flags: <defaults>
</compile_context>

<pallas_src>
import jax
import jax.numpy as jnp
from jax.experimental import pallas as pl
from jax.experimental.pallas import tpu as pltpu

THRESHOLD = 1.0


def _round_up(x, m):
    return ((x + m - 1) // m) * m


def _vmem_capacity_bytes():
    try:
        return int(pltpu.get_tpu_info().vmem_capacity_bytes)
    except Exception:
        return 64 << 20  # conservative default (v7x per-TC VMEM)


def _estimate_vmem_bytes(tt, b_pad, in_pad, tile_out, x_bytes, emit_mem_seq):
    """Rough per-pipeline-stage VMEM footprint (double-buffered blocks + scratch)."""
    xb = 2 * tt * b_pad * in_pad * x_bytes            # x block
    wb = 2 * in_pad * tile_out * 2                    # W^T tile (bf16)
    bb = 2 * 8 * tile_out * 4                         # bias tile (sublane padded)
    m0 = 2 * b_pad * tile_out * 4                     # r0 tile
    so = 2 * tt * b_pad * tile_out * 2                # spike out block (bf16)
    ms = (2 * tt * b_pad * tile_out * 4) if emit_mem_seq else 0
    mf = 2 * b_pad * tile_out * 4                     # final mem out block
    sc = b_pad * tile_out * 4                         # carried-state scratch
    interm = tt * b_pad * tile_out * 4 + tt * b_pad * in_pad * 2  # d (f32) + x cast (bf16)
    return xb + wb + bb + m0 + so + ms + mf + sc + interm


def _select_tiling(T, b_pad, in_pad, out_pad, x_bytes, emit_mem_seq, vmem_cap):
    """Pick (tile_out, TT): biggest out tile + TT*B_pad ~ 256 rows under the VMEM budget."""
    budget = int(vmem_cap * 0.55)
    tt_target = max(1, min(T, 256 // b_pad))
    tt_cands = [d for d in range(tt_target, 0, -1) if T % d == 0]
    for tile_out in (512, 256, 128):
        if out_pad % tile_out != 0:
            continue
        for tt in tt_cands:
            if _estimate_vmem_bytes(tt, b_pad, in_pad, tile_out, x_bytes,
                                    emit_mem_seq) <= budget:
                # v7x megacore: keep >= 2 tiles on the parallel j axis when possible
                # (halving only shrinks the footprint, so it still fits).
                if out_pad // tile_out == 1 and tile_out >= 256:
                    tile_out //= 2
                return tile_out, tt
    return 128, 1  # minimal fallback


def _make_kernel(TT, B_pad, tile_out, emit_mem_seq):
    """Grid = (out_tiles, T // TT).  One out-tile, TT timesteps per invocation."""

    def kernel(x_ref, wt_ref, b_ref, r0_ref, *refs):
        if emit_mem_seq:
            spike_ref, mem_seq_ref, mem_fin_ref, r_sc = refs
        else:
            spike_ref, mem_fin_ref, r_sc = refs
            mem_seq_ref = None

        tb = pl.program_id(1)

        # Initialise the carried (post-reset) membrane state for this out tile.
        @pl.when(tb == 0)
        def _():
            r_sc[...] = r0_ref[...]

        in_pad = x_ref.shape[-1]

        # One MXU call for the whole TT-step block (the Linear has no time
        # recurrence).  Weight / bias blocks stay VMEM-resident across tb.
        x_blk = x_ref[...].reshape(TT * B_pad, in_pad).astype(jnp.bfloat16)
        d = jnp.dot(x_blk, wt_ref[...],
                    preferred_element_type=jnp.float32) + b_ref[...]

        # IF recurrence over the TT timesteps (cheap VPU work, statically unrolled).
        r = r_sc[...]
        mem_last = r
        for tt in range(TT):
            mem_new = r + d[tt * B_pad:(tt + 1) * B_pad, :]
            spiked = mem_new > THRESHOLD
            spike_ref[tt] = spiked.astype(spike_ref.dtype)
            if emit_mem_seq:
                mem_seq_ref[tt] = mem_new
            r = jnp.where(spiked, 0.0, mem_new)   # hard reset, fused
            mem_last = mem_new

        r_sc[...] = r
        # Block index constant along tb -> resident output; last write wins and
        # is flushed to HBM once per out tile.
        mem_fin_ref[...] = mem_last

    return kernel


def spike_dense_if_sequence(x_seq, weight, bias, mem0, spike0=None, *,
                            return_mem_seq=False):
    """Run T timesteps of spike_dense_if in a single fused Pallas kernel.

    x_seq:  [T, B, input_dim]       (0/1 spikes, any float dtype)
    weight: [output_dim, input_dim] (PyTorch nn.Linear layout)
    bias:   [output_dim]
    mem0:   [B, output_dim]         initial membrane potential
    spike0: [B, output_dim] or None initial spike state (None == zeros, as in
                                    set_neuron_state); honoured exactly.
    Returns (spike_seq[T,B,out] bf16, mem_final[B,out] f32) and, if
    return_mem_seq, also mem_seq[T,B,out] f32.
    """
    T, B, in_dim = x_seq.shape
    out_dim, in_dim_w = weight.shape
    assert in_dim == in_dim_w, "weight / input dim mismatch"

    B_pad = _round_up(max(B, 8), 8)
    in_pad = _round_up(in_dim, 128)
    out_pad = _round_up(out_dim, 128)

    # Input spikes: pass through untouched when already lane/sublane aligned
    # (bf16 cast happens in-kernel); otherwise one fused pad+cast pass.
    if B == B_pad and in_dim == in_pad:
        x_p = x_seq
    else:
        x_p = jnp.pad(x_seq.astype(jnp.bfloat16),
                      ((0, 0), (0, B_pad - B), (0, in_pad - in_dim)))
    x_bytes = jnp.dtype(x_p.dtype).itemsize

    vmem_cap = _vmem_capacity_bytes()
    tile_out, TT = _select_tiling(T, B_pad, in_pad, out_pad, x_bytes,
                                  return_mem_seq, vmem_cap)
    num_j = out_pad // tile_out
    num_tb = T // TT

    # One-time layout plumbing for the weights / bias / initial state.
    wt_p = jnp.pad(jnp.transpose(weight).astype(jnp.bfloat16),
                   ((0, in_pad - in_dim), (0, out_pad - out_dim)))
    b_p = jnp.pad(bias.astype(jnp.float32), (0, out_pad - out_dim)).reshape(1, out_pad)

    mem0 = mem0.astype(jnp.float32)
    if spike0 is None:
        r0 = mem0                              # set_neuron_state: spike == 0
    else:
        r0 = mem0 * (1.0 - spike0.astype(jnp.float32))
    r0_p = jnp.pad(r0, ((0, B_pad - B), (0, out_pad - out_dim)))

    out_shape = [jax.ShapeDtypeStruct((T, B_pad, out_pad), jnp.bfloat16)]
    out_specs = [pl.BlockSpec((TT, B_pad, tile_out), lambda j, tb: (tb, 0, j))]
    if return_mem_seq:
        out_shape.append(jax.ShapeDtypeStruct((T, B_pad, out_pad), jnp.float32))
        out_specs.append(pl.BlockSpec((TT, B_pad, tile_out), lambda j, tb: (tb, 0, j)))
    out_shape.append(jax.ShapeDtypeStruct((B_pad, out_pad), jnp.float32))
    out_specs.append(pl.BlockSpec((B_pad, tile_out), lambda j, tb: (0, j)))

    est = _estimate_vmem_bytes(TT, B_pad, in_pad, tile_out, x_bytes, return_mem_seq)
    vmem_limit = int(min(vmem_cap, max(est + (8 << 20), 32 << 20)))

    kernel = _make_kernel(TT, B_pad, tile_out, return_mem_seq)

    outs = pl.pallas_call(
        kernel,
        out_shape=tuple(out_shape),
        grid_spec=pltpu.PrefetchScalarGridSpec(
            num_scalar_prefetch=0,
            grid=(num_j, num_tb),
            in_specs=[
                # TT-step spike block: changes every time block.
                pl.BlockSpec((TT, B_pad, in_pad), lambda j, tb: (tb, 0, 0)),
                # W^T tile / bias / initial state: constant across the inner
                # time axis -> fetched once per out tile, VMEM-resident.
                pl.BlockSpec((in_pad, tile_out), lambda j, tb: (0, j)),
                pl.BlockSpec((1, tile_out), lambda j, tb: (0, j)),
                pl.BlockSpec((B_pad, tile_out), lambda j, tb: (0, j)),
            ],
            out_specs=tuple(out_specs),
            scratch_shapes=[pltpu.VMEM((B_pad, tile_out), jnp.float32)],
        ),
        compiler_params=pltpu.CompilerParams(
            dimension_semantics=("parallel", "arbitrary"),
            vmem_limit_bytes=vmem_limit,
        ),
    )(x_p, wt_p, b_p, r0_p)

    if return_mem_seq:
        spike_seq, mem_seq, mem_fin = outs
        return (spike_seq[:, :B, :out_dim], mem_fin[:B, :out_dim],
                mem_seq[:, :B, :out_dim])
    spike_seq, mem_fin = outs
    return spike_seq[:, :B, :out_dim], mem_fin[:B, :out_dim]


def spike_dense_if_forward(input_spike, weight, bias, mem, spike=None):
    """Single forward step (PyTorch module API parity): returns (mem_new, spike_new)."""
    spike_seq, mem_fin = spike_dense_if_sequence(input_spike[None], weight, bias,
                                                 mem, spike)
    return mem_fin, spike_seq[0].astype(jnp.float32)


if __name__ == "__main__":
    key = jax.random.PRNGKey(0)

    # --- Main test: unaligned dims (exercises padding + num_j = 2 + multi time block).
    B, input_dim, output_dim, T = 4, 100, 200, 48
    k_x, k_w, k_b, k_m, k_s = jax.random.split(key, 5)

    bound = 1.0 / (input_dim ** 0.5)
    weight = jax.random.uniform(k_w, (output_dim, input_dim),
                                minval=-bound, maxval=bound, dtype=jnp.float32)
    bias = jax.random.uniform(k_b, (output_dim,),
                              minval=-bound, maxval=bound, dtype=jnp.float32)
    x_seq = (jax.random.uniform(k_x, (T, B, input_dim)) > 0.5).astype(jnp.float32)
    mem0 = jnp.zeros((B, output_dim), jnp.float32)
    spike0 = jnp.zeros_like(mem0)

    spike_seq, mem_fin, mem_seq = spike_dense_if_sequence(
        x_seq, weight, bias, mem0, spike0, return_mem_seq=True)
    jax.block_until_ready((spike_seq, mem_fin, mem_seq))

    # Pure-JAX reference with the same bf16 MXU operand precision as the kernel.
    w_bf = weight.astype(jnp.bfloat16)
    mem_r, spike_r = mem0, spike0
    mems, spikes = [], []
    for t in range(T):
        d = jnp.dot(x_seq[t].astype(jnp.bfloat16), w_bf.T,
                    preferred_element_type=jnp.float32) + bias
        mem_r = mem_r * (1.0 - spike_r) + d
        spike_r = (mem_r > THRESHOLD).astype(jnp.float32)
        mems.append(mem_r)
        spikes.append(spike_r)
    mem_ref = jnp.stack(mems)
    spike_ref = jnp.stack(spikes)

    assert jnp.allclose(mem_seq, mem_ref, atol=2e-3, rtol=2e-3), "mem_seq mismatch"
    assert jnp.allclose(mem_fin, mem_ref[-1], atol=2e-3, rtol=2e-3), "mem_final mismatch"
    safe = jnp.abs(mem_ref - THRESHOLD) > 1e-3
    assert bool(jnp.all(jnp.where(safe, spike_seq.astype(jnp.float32) == spike_ref, True))), \
        "spike_seq mismatch"

    # --- Single-step wrapper with a caller-provided (mem, spike) state (spike honoured).
    mem_s = jax.random.uniform(k_m, (B, output_dim), minval=-0.5, maxval=1.5)
    spike_s = (jax.random.uniform(k_s, (B, output_dim)) > 0.7).astype(jnp.float32)
    mem1, spike1 = spike_dense_if_forward(x_seq[0], weight, bias, mem_s, spike_s)
    jax.block_until_ready((mem1, spike1))
    d0 = jnp.dot(x_seq[0].astype(jnp.bfloat16), w_bf.T,
                 preferred_element_type=jnp.float32) + bias
    mem1_ref = mem_s * (1.0 - spike_s) + d0
    spike1_ref = (mem1_ref > THRESHOLD).astype(jnp.float32)
    assert jnp.allclose(mem1, mem1_ref, atol=2e-3, rtol=2e-3), "single-step mem mismatch"
    safe1 = jnp.abs(mem1_ref - THRESHOLD) > 1e-3
    assert bool(jnp.all(jnp.where(safe1, spike1 == spike1_ref, True))), \
        "single-step spike mismatch"

    # --- Aligned fast path (no wrapper pad/cast pass): B % 8 == 0, in_dim % 128 == 0.
    B2, in2, out2, T2 = 8, 128, 128, 4
    k2x, k2w, k2b = jax.random.split(jax.random.PRNGKey(1), 3)
    w2 = jax.random.uniform(k2w, (out2, in2), minval=-0.1, maxval=0.1, dtype=jnp.float32)
    b2 = jax.random.uniform(k2b, (out2,), minval=-0.1, maxval=0.1, dtype=jnp.float32)
    x2 = (jax.random.uniform(k2x, (T2, B2, in2)) > 0.5).astype(jnp.float32)
    m2 = jnp.zeros((B2, out2), jnp.float32)
    s2_seq, m2_fin = spike_dense_if_sequence(x2, w2, b2, m2)
    jax.block_until_ready((s2_seq, m2_fin))
    w2_bf = w2.astype(jnp.bfloat16)
    mem_r2 = m2
    spike_r2 = jnp.zeros_like(m2)
    for t in range(T2):
        d2 = jnp.dot(x2[t].astype(jnp.bfloat16), w2_bf.T,
                     preferred_element_type=jnp.float32) + b2
        mem_r2 = mem_r2 * (1.0 - spike_r2) + d2
        spike_r2 = (mem_r2 > THRESHOLD).astype(jnp.float32)
    assert jnp.allclose(m2_fin, mem_r2, atol=2e-3, rtol=2e-3), "aligned-path mem mismatch"
    safe2 = jnp.abs(mem_r2 - THRESHOLD) > 1e-3
    assert bool(jnp.all(jnp.where(safe2,
                                  s2_seq[-1].astype(jnp.float32) == spike_r2, True))), \
        "aligned-path spike mismatch"

    print("KERNEL_OK")
</pallas_src>

<mosaic_0001>
module attributes {stable_mosaic.version = 11 : i64} {
  func.func @kernel(%arg0: i32, %arg1: i32, %arg2: memref<24x8x128xbf16, #tpu.memory_space<vmem>>, %arg3: memref<128x128xbf16, #tpu.memory_space<vmem>>, %arg4: memref<1x128xf32, #tpu.memory_space<vmem>>, %arg5: memref<8x128xf32, #tpu.memory_space<vmem>>, %arg6: memref<24x8x128xbf16, #tpu.memory_space<vmem>>, %arg7: memref<24x8x128xf32, #tpu.memory_space<vmem>>, %arg8: memref<8x128xf32, #tpu.memory_space<vmem>>, %arg9: memref<8x128xf32, #tpu.memory_space<vmem>>) attributes {dimension_semantics = [#tpu.dimension_semantics<parallel>, #tpu.dimension_semantics<arbitrary>], iteration_bounds = array<i64: 2, 2>, scalar_prefetch = 0 : i64, scratch_operands = 1 : i64, tpu.core_type = #tpu.core_type<tc>, window_params = [{transform_indices = @transform_0, window_bounds = array<i64: 24, 8, 128>}, {transform_indices = @transform_1, window_bounds = array<i64: 128, 128>}, {transform_indices = @transform_2, window_bounds = array<i64: 1, 128>}, {transform_indices = @transform_3, window_bounds = array<i64: 8, 128>}, {transform_indices = @transform_4, window_bounds = array<i64: 24, 8, 128>}, {transform_indices = @transform_5, window_bounds = array<i64: 24, 8, 128>}, {transform_indices = @transform_6, window_bounds = array<i64: 8, 128>}]} {
    %c0_i32 = arith.constant 0 : i32
    %0 = arith.cmpi eq, %arg1, %c0_i32 : i32
    %1 = arith.extui %0 : i1 to i32
    %c0_i32_0 = arith.constant 0 : i32
    %2 = arith.cmpi ne, %1, %c0_i32_0 : i32
    scf.if %2 {
      %c0_182 = arith.constant 0 : index
      %c0_183 = arith.constant 0 : index
      %373 = vector.load %arg5[%c0_182, %c0_183] : memref<8x128xf32, #tpu.memory_space<vmem>>, vector<8x128xf32>
      %c0_184 = arith.constant 0 : index
      %c0_185 = arith.constant 0 : index
      %374 = vector.load %arg9[%c0_184, %c0_185] : memref<8x128xf32, #tpu.memory_space<vmem>>, vector<8x128xf32>
      tpu.vector_store %arg9[%c0_184, %c0_185], %373 {strides = array<i32>} : memref<8x128xf32, #tpu.memory_space<vmem>>, vector<8x128xf32>,
    } else {
    }
    %c0 = arith.constant 0 : index
    %c0_1 = arith.constant 0 : index
    %c0_2 = arith.constant 0 : index
    %3 = vector.load %arg2[%c0, %c0_1, %c0_2] : memref<24x8x128xbf16, #tpu.memory_space<vmem>>, vector<24x8x128xbf16>
    %4 = vector.shape_cast %3 : vector<24x8x128xbf16> to vector<192x128xbf16>
    %c0_3 = arith.constant 0 : index
    %c0_4 = arith.constant 0 : index
    %5 = vector.load %arg3[%c0_3, %c0_4] : memref<128x128xbf16, #tpu.memory_space<vmem>>, vector<128x128xbf16>
    %cst = arith.constant dense<0.000000e+00> : vector<192x128xf32>
    %6 = tpu.matmul %4, %5, %cst {dimension_numbers = #tpu.dot_dimension_numbers<[1], [0], [0], [1], [0, 0, 1, 1], [], []>} : vector<192x128xbf16>, vector<128x128xbf16>, vector<192x128xf32> -> vector<192x128xf32>
    %c0_5 = arith.constant 0 : index
    %c0_6 = arith.constant 0 : index
    %7 = vector.load %arg4[%c0_5, %c0_6] : memref<1x128xf32, #tpu.memory_space<vmem>>, vector<1x128xf32>
    %8 = vector.broadcast %7 : vector<1x128xf32> to vector<192x128xf32>
    %9 = arith.addf %6, %8 : vector<192x128xf32>
    %c0_7 = arith.constant 0 : index
    %c0_8 = arith.constant 0 : index
    %10 = vector.load %arg9[%c0_7, %c0_8] : memref<8x128xf32, #tpu.memory_space<vmem>>, vector<8x128xf32>
    %11 = vector.extract_strided_slice %9 {offsets = [0, 0], sizes = [8, 128], strides = [1, 1]} : vector<192x128xf32> to vector<8x128xf32>
    %12 = arith.addf %10, %11 : vector<8x128xf32>
    %cst_9 = arith.constant 1.000000e+00 : f32
    %13 = vector.broadcast %cst_9 : f32 to vector<8x128xf32>
    %14 = arith.cmpf ogt, %12, %13 : vector<8x128xf32>
    %15 = arith.extui %14 : vector<8x128xi1> to vector<8x128xi32>
    %16 = arith.sitofp %15 : vector<8x128xi32> to vector<8x128xf32>
    %17 = arith.truncf %16 : vector<8x128xf32> to vector<8x128xbf16>
    %c0_10 = arith.constant 0 : index
    %c0_11 = arith.constant 0 : index
    %c0_12 = arith.constant 0 : index
    %18 = vector.load %arg6[%c0_10, %c0_11, %c0_12] : memref<24x8x128xbf16, #tpu.memory_space<vmem>>, vector<1x8x128xbf16>
    %19 = vector.shape_cast %18 : vector<1x8x128xbf16> to vector<8x128xbf16>
    %20 = vector.shape_cast %17 : vector<8x128xbf16> to vector<1x8x128xbf16>
    tpu.vector_store %arg6[%c0_10, %c0_11, %c0_12], %20 {strides = array<i32>} : memref<24x8x128xbf16, #tpu.memory_space<vmem>>, vector<1x8x128xbf16>,
    %c0_13 = arith.constant 0 : index
    %c0_14 = arith.constant 0 : index
    %c0_15 = arith.constant 0 : index
    %21 = vector.load %arg7[%c0_13, %c0_14, %c0_15] : memref<24x8x128xf32, #tpu.memory_space<vmem>>, vector<1x8x128xf32>
    %22 = vector.shape_cast %21 : vector<1x8x128xf32> to vector<8x128xf32>
    %23 = vector.shape_cast %12 : vector<8x128xf32> to vector<1x8x128xf32>
    tpu.vector_store %arg7[%c0_13, %c0_14, %c0_15], %23 {strides = array<i32>} : memref<24x8x128xf32, #tpu.memory_space<vmem>>, vector<1x8x128xf32>,
    %cst_16 = arith.constant 0.000000e+00 : f32
    %24 = vector.broadcast %cst_16 : f32 to vector<8x128xf32>
    %25 = arith.select %14, %24, %12 : vector<8x128xi1>, vector<8x128xf32>
    %26 = vector.extract_strided_slice %9 {offsets = [8, 0], sizes = [8, 128], strides = [1, 1]} : vector<192x128xf32> to vector<8x128xf32>
    %27 = arith.addf %25, %26 : vector<8x128xf32>
    %cst_17 = arith.constant 1.000000e+00 : f32
    %28 = vector.broadcast %cst_17 : f32 to vector<8x128xf32>
    %29 = arith.cmpf ogt, %27, %28 : vector<8x128xf32>
    %30 = arith.extui %29 : vector<8x128xi1> to vector<8x128xi32>
    %31 = arith.sitofp %30 : vector<8x128xi32> to vector<8x128xf32>
    %32 = arith.truncf %31 : vector<8x128xf32> to vector<8x128xbf16>
    %c1 = arith.constant 1 : index
    %c0_18 = arith.constant 0 : index
    %c0_19 = arith.constant 0 : index
    %33 = vector.load %arg6[%c1, %c0_18, %c0_19] : memref<24x8x128xbf16, #tpu.memory_space<vmem>>, vector<1x8x128xbf16>
    %34 = vector.shape_cast %33 : vector<1x8x128xbf16> to vector<8x128xbf16>
    %35 = vector.shape_cast %32 : vector<8x128xbf16> to vector<1x8x128xbf16>
    tpu.vector_store %arg6[%c1, %c0_18, %c0_19], %35 {strides = array<i32>} : memref<24x8x128xbf16, #tpu.memory_space<vmem>>, vector<1x8x128xbf16>,
    %c1_20 = arith.constant 1 : index
    %c0_21 = arith.constant 0 : index
    %c0_22 = arith.constant 0 : index
    %36 = vector.load %arg7[%c1_20, %c0_21, %c0_22] : memref<24x8x128xf32, #tpu.memory_space<vmem>>, vector<1x8x128xf32>
    %37 = vector.shape_cast %36 : vector<1x8x128xf32> to vector<8x128xf32>
    %38 = vector.shape_cast %27 : vector<8x128xf32> to vector<1x8x128xf32>
    tpu.vector_store %arg7[%c1_20, %c0_21, %c0_22], %38 {strides = array<i32>} : memref<24x8x128xf32, #tpu.memory_space<vmem>>, vector<1x8x128xf32>,
    %cst_23 = arith.constant 0.000000e+00 : f32
    %39 = vector.broadcast %cst_23 : f32 to vector<8x128xf32>
    %40 = arith.select %29, %39, %27 : vector<8x128xi1>, vector<8x128xf32>
    %41 = vector.extract_strided_slice %9 {offsets = [16, 0], sizes = [8, 128], strides = [1, 1]} : vector<192x128xf32> to vector<8x128xf32>
    %42 = arith.addf %40, %41 : vector<8x128xf32>
    %cst_24 = arith.constant 1.000000e+00 : f32
    %43 = vector.broadcast %cst_24 : f32 to vector<8x128xf32>
    %44 = arith.cmpf ogt, %42, %43 : vector<8x128xf32>
    %45 = arith.extui %44 : vector<8x128xi1> to vector<8x128xi32>
    %46 = arith.sitofp %45 : vector<8x128xi32> to vector<8x128xf32>
    %47 = arith.truncf %46 : vector<8x128xf32> to vector<8x128xbf16>
    %c2 = arith.constant 2 : index
    %c0_25 = arith.constant 0 : index
    %c0_26 = arith.constant 0 : index
    %48 = vector.load %arg6[%c2, %c0_25, %c0_26] : memref<24x8x128xbf16, #tpu.memory_space<vmem>>, vector<1x8x128xbf16>
    %49 = vector.shape_cast %48 : vector<1x8x128xbf16> to vector<8x128xbf16>
    %50 = vector.shape_cast %47 : vector<8x128xbf16> to vector<1x8x128xbf16>
    tpu.vector_store %arg6[%c2, %c0_25, %c0_26], %50 {strides = array<i32>} : memref<24x8x128xbf16, #tpu.memory_space<vmem>>, vector<1x8x128xbf16>,
    %c2_27 = arith.constant 2 : index
    %c0_28 = arith.constant 0 : index
    %c0_29 = arith.constant 0 : index
    %51 = vector.load %arg7[%c2_27, %c0_28, %c0_29] : memref<24x8x128xf32, #tpu.memory_space<vmem>>, vector<1x8x128xf32>
    %52 = vector.shape_cast %51 : vector<1x8x128xf32> to vector<8x128xf32>
    %53 = vector.shape_cast %42 : vector<8x128xf32> to vector<1x8x128xf32>
    tpu.vector_store %arg7[%c2_27, %c0_28, %c0_29], %53 {strides = array<i32>} : memref<24x8x128xf32, #tpu.memory_space<vmem>>, vector<1x8x128xf32>,
    %cst_30 = arith.constant 0.000000e+00 : f32
    %54 = vector.broadcast %cst_30 : f32 to vector<8x128xf32>
    %55 = arith.select %44, %54, %42 : vector<8x128xi1>, vector<8x128xf32>
    %56 = vector.extract_strided_slice %9 {offsets = [24, 0], sizes = [8, 128], strides = [1, 1]} : vector<192x128xf32> to vector<8x128xf32>
    %57 = arith.addf %55, %56 : vector<8x128xf32>
    %cst_31 = arith.constant 1.000000e+00 : f32
    %58 = vector.broadcast %cst_31 : f32 to vector<8x128xf32>
    %59 = arith.cmpf ogt, %57, %58 : vector<8x128xf32>
    %60 = arith.extui %59 : vector<8x128xi1> to vector<8x128xi32>
    %61 = arith.sitofp %60 : vector<8x128xi32> to vector<8x128xf32>
    %62 = arith.truncf %61 : vector<8x128xf32> to vector<8x128xbf16>
    %c3 = arith.constant 3 : index
    %c0_32 = arith.constant 0 : index
    %c0_33 = arith.constant 0 : index
    %63 = vector.load %arg6[%c3, %c0_32, %c0_33] : memref<24x8x128xbf16, #tpu.memory_space<vmem>>, vector<1x8x128xbf16>
    %64 = vector.shape_cast %63 : vector<1x8x128xbf16> to vector<8x128xbf16>
    %65 = vector.shape_cast %62 : vector<8x128xbf16> to vector<1x8x128xbf16>
    tpu.vector_store %arg6[%c3, %c0_32, %c0_33], %65 {strides = array<i32>} : memref<24x8x128xbf16, #tpu.memory_space<vmem>>, vector<1x8x128xbf16>,
    %c3_34 = arith.constant 3 : index
    %c0_35 = arith.constant 0 : index
    %c0_36 = arith.constant 0 : index
    %66 = vector.load %arg7[%c3_34, %c0_35, %c0_36] : memref<24x8x128xf32, #tpu.memory_space<vmem>>, vector<1x8x128xf32>
    %67 = vector.shape_cast %66 : vector<1x8x128xf32> to vector<8x128xf32>
    %68 = vector.shape_cast %57 : vector<8x128xf32> to vector<1x8x128xf32>
    tpu.vector_store %arg7[%c3_34, %c0_35, %c0_36], %68 {strides = array<i32>} : memref<24x8x128xf32, #tpu.memory_space<vmem>>, vector<1x8x128xf32>,
    %cst_37 = arith.constant 0.000000e+00 : f32
    %69 = vector.broadcast %cst_37 : f32 to vector<8x128xf32>
    %70 = arith.select %59, %69, %57 : vector<8x128xi1>, vector<8x128xf32>
    %71 = vector.extract_strided_slice %9 {offsets = [32, 0], sizes = [8, 128], strides = [1, 1]} : vector<192x128xf32> to vector<8x128xf32>
    %72 = arith.addf %70, %71 : vector<8x128xf32>
    %cst_38 = arith.constant 1.000000e+00 : f32
    %73 = vector.broadcast %cst_38 : f32 to vector<8x128xf32>
    %74 = arith.cmpf ogt, %72, %73 : vector<8x128xf32>
    %75 = arith.extui %74 : vector<8x128xi1> to vector<8x128xi32>
    %76 = arith.sitofp %75 : vector<8x128xi32> to vector<8x128xf32>
    %77 = arith.truncf %76 : vector<8x128xf32> to vector<8x128xbf16>
    %c4 = arith.constant 4 : index
    %c0_39 = arith.constant 0 : index
    %c0_40 = arith.constant 0 : index
    %78 = vector.load %arg6[%c4, %c0_39, %c0_40] : memref<24x8x128xbf16, #tpu.memory_space<vmem>>, vector<1x8x128xbf16>
    %79 = vector.shape_cast %78 : vector<1x8x128xbf16> to vector<8x128xbf16>
    %80 = vector.shape_cast %77 : vector<8x128xbf16> to vector<1x8x128xbf16>
    tpu.vector_store %arg6[%c4, %c0_39, %c0_40], %80 {strides = array<i32>} : memref<24x8x128xbf16, #tpu.memory_space<vmem>>, vector<1x8x128xbf16>,
    %c4_41 = arith.constant 4 : index
    %c0_42 = arith.constant 0 : index
    %c0_43 = arith.constant 0 : index
    %81 = vector.load %arg7[%c4_41, %c0_42, %c0_43] : memref<24x8x128xf32, #tpu.memory_space<vmem>>, vector<1x8x128xf32>
    %82 = vector.shape_cast %81 : vector<1x8x128xf32> to vector<8x128xf32>
    %83 = vector.shape_cast %72 : vector<8x128xf32> to vector<1x8x128xf32>
    tpu.vector_store %arg7[%c4_41, %c0_42, %c0_43], %83 {strides = array<i32>} : memref<24x8x128xf32, #tpu.memory_space<vmem>>, vector<1x8x128xf32>,
    %cst_44 = arith.constant 0.000000e+00 : f32
    %84 = vector.broadcast %cst_44 : f32 to vector<8x128xf32>
    %85 = arith.select %74, %84, %72 : vector<8x128xi1>, vector<8x128xf32>
    %86 = vector.extract_strided_slice %9 {offsets = [40, 0], sizes = [8, 128], strides = [1, 1]} : vector<192x128xf32> to vector<8x128xf32>
    %87 = arith.addf %85, %86 : vector<8x128xf32>
    %cst_45 = arith.constant 1.000000e+00 : f32
    %88 = vector.broadcast %cst_45 : f32 to vector<8x128xf32>
    %89 = arith.cmpf ogt, %87, %88 : vector<8x128xf32>
    %90 = arith.extui %89 : vector<8x128xi1> to vector<8x128xi32>
    %91 = arith.sitofp %90 : vector<8x128xi32> to vector<8x128xf32>
    %92 = arith.truncf %91 : vector<8x128xf32> to vector<8x128xbf16>
    %c5 = arith.constant 5 : index
    %c0_46 = arith.constant 0 : index
    %c0_47 = arith.constant 0 : index
    %93 = vector.load %arg6[%c5, %c0_46, %c0_47] : memref<24x8x128xbf16, #tpu.memory_space<vmem>>, vector<1x8x128xbf16>
    %94 = vector.shape_cast %93 : vector<1x8x128xbf16> to vector<8x128xbf16>
    %95 = vector.shape_cast %92 : vector<8x128xbf16> to vector<1x8x128xbf16>
    tpu.vector_store %arg6[%c5, %c0_46, %c0_47], %95 {strides = array<i32>} : memref<24x8x128xbf16, #tpu.memory_space<vmem>>, vector<1x8x128xbf16>,
    %c5_48 = arith.constant 5 : index
    %c0_49 = arith.constant 0 : index
    %c0_50 = arith.constant 0 : index
    %96 = vector.load %arg7[%c5_48, %c0_49, %c0_50] : memref<24x8x128xf32, #tpu.memory_space<vmem>>, vector<1x8x128xf32>
    %97 = vector.shape_cast %96 : vector<1x8x128xf32> to vector<8x128xf32>
    %98 = vector.shape_cast %87 : vector<8x128xf32> to vector<1x8x128xf32>
    tpu.vector_store %arg7[%c5_48, %c0_49, %c0_50], %98 {strides = array<i32>} : memref<24x8x128xf32, #tpu.memory_space<vmem>>, vector<1x8x128xf32>,
    %cst_51 = arith.constant 0.000000e+00 : f32
    %99 = vector.broadcast %cst_51 : f32 to vector<8x128xf32>
    %100 = arith.select %89, %99, %87 : vector<8x128xi1>, vector<8x128xf32>
    %101 = vector.extract_strided_slice %9 {offsets = [48, 0], sizes = [8, 128], strides = [1, 1]} : vector<192x128xf32> to vector<8x128xf32>
    %102 = arith.addf %100, %101 : vector<8x128xf32>
    %cst_52 = arith.constant 1.000000e+00 : f32
    %103 = vector.broadcast %cst_52 : f32 to vector<8x128xf32>
    %104 = arith.cmpf ogt, %102, %103 : vector<8x128xf32>
    %105 = arith.extui %104 : vector<8x128xi1> to vector<8x128xi32>
    %106 = arith.sitofp %105 : vector<8x128xi32> to vector<8x128xf32>
    %107 = arith.truncf %106 : vector<8x128xf32> to vector<8x128xbf16>
    %c6 = arith.constant 6 : index
    %c0_53 = arith.constant 0 : index
    %c0_54 = arith.constant 0 : index
    %108 = vector.load %arg6[%c6, %c0_53, %c0_54] : memref<24x8x128xbf16, #tpu.memory_space<vmem>>, vector<1x8x128xbf16>
    %109 = vector.shape_cast %108 : vector<1x8x128xbf16> to vector<8x128xbf16>
    %110 = vector.shape_cast %107 : vector<8x128xbf16> to vector<1x8x128xbf16>
    tpu.vector_store %arg6[%c6, %c0_53, %c0_54], %110 {strides = array<i32>} : memref<24x8x128xbf16, #tpu.memory_space<vmem>>, vector<1x8x128xbf16>,
    %c6_55 = arith.constant 6 : index
    %c0_56 = arith.constant 0 : index
    %c0_57 = arith.constant 0 : index
    %111 = vector.load %arg7[%c6_55, %c0_56, %c0_57] : memref<24x8x128xf32, #tpu.memory_space<vmem>>, vector<1x8x128xf32>
    %112 = vector.shape_cast %111 : vector<1x8x128xf32> to vector<8x128xf32>
    %113 = vector.shape_cast %102 : vector<8x128xf32> to vector<1x8x128xf32>
    tpu.vector_store %arg7[%c6_55, %c0_56, %c0_57], %113 {strides = array<i32>} : memref<24x8x128xf32, #tpu.memory_space<vmem>>, vector<1x8x128xf32>,
    %cst_58 = arith.constant 0.000000e+00 : f32
    %114 = vector.broadcast %cst_58 : f32 to vector<8x128xf32>
    %115 = arith.select %104, %114, %102 : vector<8x128xi1>, vector<8x128xf32>
    %116 = vector.extract_strided_slice %9 {offsets = [56, 0], sizes = [8, 128], strides = [1, 1]} : vector<192x128xf32> to vector<8x128xf32>
    %117 = arith.addf %115, %116 : vector<8x128xf32>
    %cst_59 = arith.constant 1.000000e+00 : f32
    %118 = vector.broadcast %cst_59 : f32 to vector<8x128xf32>
    %119 = arith.cmpf ogt, %117, %118 : vector<8x128xf32>
    %120 = arith.extui %119 : vector<8x128xi1> to vector<8x128xi32>
    %121 = arith.sitofp %120 : vector<8x128xi32> to vector<8x128xf32>
    %122 = arith.truncf %121 : vector<8x128xf32> to vector<8x128xbf16>
    %c7 = arith.constant 7 : index
    %c0_60 = arith.constant 0 : index
    %c0_61 = arith.constant 0 : index
    %123 = vector.load %arg6[%c7, %c0_60, %c0_61] : memref<24x8x128xbf16, #tpu.memory_space<vmem>>, vector<1x8x128xbf16>
    %124 = vector.shape_cast %123 : vector<1x8x128xbf16> to vector<8x128xbf16>
    %125 = vector.shape_cast %122 : vector<8x128xbf16> to vector<1x8x128xbf16>
    tpu.vector_store %arg6[%c7, %c0_60, %c0_61], %125 {strides = array<i32>} : memref<24x8x128xbf16, #tpu.memory_space<vmem>>, vector<1x8x128xbf16>,
    %c7_62 = arith.constant 7 : index
    %c0_63 = arith.constant 0 : index
    %c0_64 = arith.constant 0 : index
    %126 = vector.load %arg7[%c7_62, %c0_63, %c0_64] : memref<24x8x128xf32, #tpu.memory_space<vmem>>, vector<1x8x128xf32>
    %127 = vector.shape_cast %126 : vector<1x8x128xf32> to vector<8x128xf32>
    %128 = vector.shape_cast %117 : vector<8x128xf32> to vector<1x8x128xf32>
    tpu.vector_store %arg7[%c7_62, %c0_63, %c0_64], %128 {strides = array<i32>} : memref<24x8x128xf32, #tpu.memory_space<vmem>>, vector<1x8x128xf32>,
    %cst_65 = arith.constant 0.000000e+00 : f32
    %129 = vector.broadcast %cst_65 : f32 to vector<8x128xf32>
    %130 = arith.select %119, %129, %117 : vector<8x128xi1>, vector<8x128xf32>
    %131 = vector.extract_strided_slice %9 {offsets = [64, 0], sizes = [8, 128], strides = [1, 1]} : vector<192x128xf32> to vector<8x128xf32>
    %132 = arith.addf %130, %131 : vector<8x128xf32>
    %cst_66 = arith.constant 1.000000e+00 : f32
    %133 = vector.broadcast %cst_66 : f32 to vector<8x128xf32>
    %134 = arith.cmpf ogt, %132, %133 : vector<8x128xf32>
    %135 = arith.extui %134 : vector<8x128xi1> to vector<8x128xi32>
    %136 = arith.sitofp %135 : vector<8x128xi32> to vector<8x128xf32>
    %137 = arith.truncf %136 : vector<8x128xf32> to vector<8x128xbf16>
    %c8 = arith.constant 8 : index
    %c0_67 = arith.constant 0 : index
    %c0_68 = arith.constant 0 : index
    %138 = vector.load %arg6[%c8, %c0_67, %c0_68] : memref<24x8x128xbf16, #tpu.memory_space<vmem>>, vector<1x8x128xbf16>
    %139 = vector.shape_cast %138 : vector<1x8x128xbf16> to vector<8x128xbf16>
    %140 = vector.shape_cast %137 : vector<8x128xbf16> to vector<1x8x128xbf16>
    tpu.vector_store %arg6[%c8, %c0_67, %c0_68], %140 {strides = array<i32>} : memref<24x8x128xbf16, #tpu.memory_space<vmem>>, vector<1x8x128xbf16>,
    %c8_69 = arith.constant 8 : index
    %c0_70 = arith.constant 0 : index
    %c0_71 = arith.constant 0 : index
    %141 = vector.load %arg7[%c8_69, %c0_70, %c0_71] : memref<24x8x128xf32, #tpu.memory_space<vmem>>, vector<1x8x128xf32>
    %142 = vector.shape_cast %141 : vector<1x8x128xf32> to vector<8x128xf32>
    %143 = vector.shape_cast %132 : vector<8x128xf32> to vector<1x8x128xf32>
    tpu.vector_store %arg7[%c8_69, %c0_70, %c0_71], %143 {strides = array<i32>} : memref<24x8x128xf32, #tpu.memory_space<vmem>>, vector<1x8x128xf32>,
    %cst_72 = arith.constant 0.000000e+00 : f32
    %144 = vector.broadcast %cst_72 : f32 to vector<8x128xf32>
    %145 = arith.select %134, %144, %132 : vector<8x128xi1>, vector<8x128xf32>
    %146 = vector.extract_strided_slice %9 {offsets = [72, 0], sizes = [8, 128], strides = [1, 1]} : vector<192x128xf32> to vector<8x128xf32>
    %147 = arith.addf %145, %146 : vector<8x128xf32>
    %cst_73 = arith.constant 1.000000e+00 : f32
    %148 = vector.broadcast %cst_73 : f32 to vector<8x128xf32>
    %149 = arith.cmpf ogt, %147, %148 : vector<8x128xf32>
    %150 = arith.extui %149 : vector<8x128xi1> to vector<8x128xi32>
    %151 = arith.sitofp %150 : vector<8x128xi32> to vector<8x128xf32>
    %152 = arith.truncf %151 : vector<8x128xf32> to vector<8x128xbf16>
    %c9 = arith.constant 9 : index
    %c0_74 = arith.constant 0 : index
    %c0_75 = arith.constant 0 : index
    %153 = vector.load %arg6[%c9, %c0_74, %c0_75] : memref<24x8x128xbf16, #tpu.memory_space<vmem>>, vector<1x8x128xbf16>
    %154 = vector.shape_cast %153 : vector<1x8x128xbf16> to vector<8x128xbf16>
    %155 = vector.shape_cast %152 : vector<8x128xbf16> to vector<1x8x128xbf16>
    tpu.vector_store %arg6[%c9, %c0_74, %c0_75], %155 {strides = array<i32>} : memref<24x8x128xbf16, #tpu.memory_space<vmem>>, vector<1x8x128xbf16>,
    %c9_76 = arith.constant 9 : index
    %c0_77 = arith.constant 0 : index
    %c0_78 = arith.constant 0 : index
    %156 = vector.load %arg7[%c9_76, %c0_77, %c0_78] : memref<24x8x128xf32, #tpu.memory_space<vmem>>, vector<1x8x128xf32>
    %157 = vector.shape_cast %156 : vector<1x8x128xf32> to vector<8x128xf32>
    %158 = vector.shape_cast %147 : vector<8x128xf32> to vector<1x8x128xf32>
    tpu.vector_store %arg7[%c9_76, %c0_77, %c0_78], %158 {strides = array<i32>} : memref<24x8x128xf32, #tpu.memory_space<vmem>>, vector<1x8x128xf32>,
    %cst_79 = arith.constant 0.000000e+00 : f32
    %159 = vector.broadcast %cst_79 : f32 to vector<8x128xf32>
    %160 = arith.select %149, %159, %147 : vector<8x128xi1>, vector<8x128xf32>
    %161 = vector.extract_strided_slice %9 {offsets = [80, 0], sizes = [8, 128], strides = [1, 1]} : vector<192x128xf32> to vector<8x128xf32>
    %162 = arith.addf %160, %161 : vector<8x128xf32>
    %cst_80 = arith.constant 1.000000e+00 : f32
    %163 = vector.broadcast %cst_80 : f32 to vector<8x128xf32>
    %164 = arith.cmpf ogt, %162, %163 : vector<8x128xf32>
    %165 = arith.extui %164 : vector<8x128xi1> to vector<8x128xi32>
    %166 = arith.sitofp %165 : vector<8x128xi32> to vector<8x128xf32>
    %167 = arith.truncf %166 : vector<8x128xf32> to vector<8x128xbf16>
    %c10 = arith.constant 10 : index
    %c0_81 = arith.constant 0 : index
    %c0_82 = arith.constant 0 : index
    %168 = vector.load %arg6[%c10, %c0_81, %c0_82] : memref<24x8x128xbf16, #tpu.memory_space<vmem>>, vector<1x8x128xbf16>
    %169 = vector.shape_cast %168 : vector<1x8x128xbf16> to vector<8x128xbf16>
    %170 = vector.shape_cast %167 : vector<8x128xbf16> to vector<1x8x128xbf16>
    tpu.vector_store %arg6[%c10, %c0_81, %c0_82], %170 {strides = array<i32>} : memref<24x8x128xbf16, #tpu.memory_space<vmem>>, vector<1x8x128xbf16>,
    %c10_83 = arith.constant 10 : index
    %c0_84 = arith.constant 0 : index
    %c0_85 = arith.constant 0 : index
    %171 = vector.load %arg7[%c10_83, %c0_84, %c0_85] : memref<24x8x128xf32, #tpu.memory_space<vmem>>, vector<1x8x128xf32>
    %172 = vector.shape_cast %171 : vector<1x8x128xf32> to vector<8x128xf32>
    %173 = vector.shape_cast %162 : vector<8x128xf32> to vector<1x8x128xf32>
    tpu.vector_store %arg7[%c10_83, %c0_84, %c0_85], %173 {strides = array<i32>} : memref<24x8x128xf32, #tpu.memory_space<vmem>>, vector<1x8x128xf32>,
    %cst_86 = arith.constant 0.000000e+00 : f32
    %174 = vector.broadcast %cst_86 : f32 to vector<8x128xf32>
    %175 = arith.select %164, %174, %162 : vector<8x128xi1>, vector<8x128xf32>
    %176 = vector.extract_strided_slice %9 {offsets = [88, 0], sizes = [8, 128], strides = [1, 1]} : vector<192x128xf32> to vector<8x128xf32>
    %177 = arith.addf %175, %176 : vector<8x128xf32>
    %cst_87 = arith.constant 1.000000e+00 : f32
    %178 = vector.broadcast %cst_87 : f32 to vector<8x128xf32>
    %179 = arith.cmpf ogt, %177, %178 : vector<8x128xf32>
    %180 = arith.extui %179 : vector<8x128xi1> to vector<8x128xi32>
    %181 = arith.sitofp %180 : vector<8x128xi32> to vector<8x128xf32>
    %182 = arith.truncf %181 : vector<8x128xf32> to vector<8x128xbf16>
    %c11 = arith.constant 11 : index
    %c0_88 = arith.constant 0 : index
    %c0_89 = arith.constant 0 : index
    %183 = vector.load %arg6[%c11, %c0_88, %c0_89] : memref<24x8x128xbf16, #tpu.memory_space<vmem>>, vector<1x8x128xbf16>
    %184 = vector.shape_cast %183 : vector<1x8x128xbf16> to vector<8x128xbf16>
    %185 = vector.shape_cast %182 : vector<8x128xbf16> to vector<1x8x128xbf16>
    tpu.vector_store %arg6[%c11, %c0_88, %c0_89], %185 {strides = array<i32>} : memref<24x8x128xbf16, #tpu.memory_space<vmem>>, vector<1x8x128xbf16>,
    %c11_90 = arith.constant 11 : index
    %c0_91 = arith.constant 0 : index
    %c0_92 = arith.constant 0 : index
    %186 = vector.load %arg7[%c11_90, %c0_91, %c0_92] : memref<24x8x128xf32, #tpu.memory_space<vmem>>, vector<1x8x128xf32>
    %187 = vector.shape_cast %186 : vector<1x8x128xf32> to vector<8x128xf32>
    %188 = vector.shape_cast %177 : vector<8x128xf32> to vector<1x8x128xf32>
    tpu.vector_store %arg7[%c11_90, %c0_91, %c0_92], %188 {strides = array<i32>} : memref<24x8x128xf32, #tpu.memory_space<vmem>>, vector<1x8x128xf32>,
    %cst_93 = arith.constant 0.000000e+00 : f32
    %189 = vector.broadcast %cst_93 : f32 to vector<8x128xf32>
    %190 = arith.select %179, %189, %177 : vector<8x128xi1>, vector<8x128xf32>
    %191 = vector.extract_strided_slice %9 {offsets = [96, 0], sizes = [8, 128], strides = [1, 1]} : vector<192x128xf32> to vector<8x128xf32>
    %192 = arith.addf %190, %191 : vector<8x128xf32>
    %cst_94 = arith.constant 1.000000e+00 : f32
    %193 = vector.broadcast %cst_94 : f32 to vector<8x128xf32>
    %194 = arith.cmpf ogt, %192, %193 : vector<8x128xf32>
    %195 = arith.extui %194 : vector<8x128xi1> to vector<8x128xi32>
    %196 = arith.sitofp %195 : vector<8x128xi32> to vector<8x128xf32>
    %197 = arith.truncf %196 : vector<8x128xf32> to vector<8x128xbf16>
    %c12 = arith.constant 12 : index
    %c0_95 = arith.constant 0 : index
    %c0_96 = arith.constant 0 : index
    %198 = vector.load %arg6[%c12, %c0_95, %c0_96] : memref<24x8x128xbf16, #tpu.memory_space<vmem>>, vector<1x8x128xbf16>
    %199 = vector.shape_cast %198 : vector<1x8x128xbf16> to vector<8x128xbf16>
    %200 = vector.shape_cast %197 : vector<8x128xbf16> to vector<1x8x128xbf16>
    tpu.vector_store %arg6[%c12, %c0_95, %c0_96], %200 {strides = array<i32>} : memref<24x8x128xbf16, #tpu.memory_space<vmem>>, vector<1x8x128xbf16>,
    %c12_97 = arith.constant 12 : index
    %c0_98 = arith.constant 0 : index
    %c0_99 = arith.constant 0 : index
    %201 = vector.load %arg7[%c12_97, %c0_98, %c0_99] : memref<24x8x128xf32, #tpu.memory_space<vmem>>, vector<1x8x128xf32>
    %202 = vector.shape_cast %201 : vector<1x8x128xf32> to vector<8x128xf32>
    %203 = vector.shape_cast %192 : vector<8x128xf32> to vector<1x8x128xf32>
    tpu.vector_store %arg7[%c12_97, %c0_98, %c0_99], %203 {strides = array<i32>} : memref<24x8x128xf32, #tpu.memory_space<vmem>>, vector<1x8x128xf32>,
    %cst_100 = arith.constant 0.000000e+00 : f32
    %204 = vector.broadcast %cst_100 : f32 to vector<8x128xf32>
    %205 = arith.select %194, %204, %192 : vector<8x128xi1>, vector<8x128xf32>
    %206 = vector.extract_strided_slice %9 {offsets = [104, 0], sizes = [8, 128], strides = [1, 1]} : vector<192x128xf32> to vector<8x128xf32>
    %207 = arith.addf %205, %206 : vector<8x128xf32>
    %cst_101 = arith.constant 1.000000e+00 : f32
    %208 = vector.broadcast %cst_101 : f32 to vector<8x128xf32>
    %209 = arith.cmpf ogt, %207, %208 : vector<8x128xf32>
    %210 = arith.extui %209 : vector<8x128xi1> to vector<8x128xi32>
    %211 = arith.sitofp %210 : vector<8x128xi32> to vector<8x128xf32>
    %212 = arith.truncf %211 : vector<8x128xf32> to vector<8x128xbf16>
    %c13 = arith.constant 13 : index
    %c0_102 = arith.constant 0 : index
    %c0_103 = arith.constant 0 : index
    %213 = vector.load %arg6[%c13, %c0_102, %c0_103] : memref<24x8x128xbf16, #tpu.memory_space<vmem>>, vector<1x8x128xbf16>
    %214 = vector.shape_cast %213 : vector<1x8x128xbf16> to vector<8x128xbf16>
    %215 = vector.shape_cast %212 : vector<8x128xbf16> to vector<1x8x128xbf16>
    tpu.vector_store %arg6[%c13, %c0_102, %c0_103], %215 {strides = array<i32>} : memref<24x8x128xbf16, #tpu.memory_space<vmem>>, vector<1x8x128xbf16>,
    %c13_104 = arith.constant 13 : index
    %c0_105 = arith.constant 0 : index
    %c0_106 = arith.constant 0 : index
    %216 = vector.load %arg7[%c13_104, %c0_105, %c0_106] : memref<24x8x128xf32, #tpu.memory_space<vmem>>, vector<1x8x128xf32>
    %217 = vector.shape_cast %216 : vector<1x8x128xf32> to vector<8x128xf32>
    %218 = vector.shape_cast %207 : vector<8x128xf32> to vector<1x8x128xf32>
    tpu.vector_store %arg7[%c13_104, %c0_105, %c0_106], %218 {strides = array<i32>} : memref<24x8x128xf32, #tpu.memory_space<vmem>>, vector<1x8x128xf32>,
    %cst_107 = arith.constant 0.000000e+00 : f32
    %219 = vector.broadcast %cst_107 : f32 to vector<8x128xf32>
    %220 = arith.select %209, %219, %207 : vector<8x128xi1>, vector<8x128xf32>
    %221 = vector.extract_strided_slice %9 {offsets = [112, 0], sizes = [8, 128], strides = [1, 1]} : vector<192x128xf32> to vector<8x128xf32>
    %222 = arith.addf %220, %221 : vector<8x128xf32>
    %cst_108 = arith.constant 1.000000e+00 : f32
    %223 = vector.broadcast %cst_108 : f32 to vector<8x128xf32>
    %224 = arith.cmpf ogt, %222, %223 : vector<8x128xf32>
    %225 = arith.extui %224 : vector<8x128xi1> to vector<8x128xi32>
    %226 = arith.sitofp %225 : vector<8x128xi32> to vector<8x128xf32>
    %227 = arith.truncf %226 : vector<8x128xf32> to vector<8x128xbf16>
    %c14 = arith.constant 14 : index
    %c0_109 = arith.constant 0 : index
    %c0_110 = arith.constant 0 : index
    %228 = vector.load %arg6[%c14, %c0_109, %c0_110] : memref<24x8x128xbf16, #tpu.memory_space<vmem>>, vector<1x8x128xbf16>
    %229 = vector.shape_cast %228 : vector<1x8x128xbf16> to vector<8x128xbf16>
    %230 = vector.shape_cast %227 : vector<8x128xbf16> to vector<1x8x128xbf16>
    tpu.vector_store %arg6[%c14, %c0_109, %c0_110], %230 {strides = array<i32>} : memref<24x8x128xbf16, #tpu.memory_space<vmem>>, vector<1x8x128xbf16>,
    %c14_111 = arith.constant 14 : index
    %c0_112 = arith.constant 0 : index
    %c0_113 = arith.constant 0 : index
    %231 = vector.load %arg7[%c14_111, %c0_112, %c0_113] : memref<24x8x128xf32, #tpu.memory_space<vmem>>, vector<1x8x128xf32>
    %232 = vector.shape_cast %231 : vector<1x8x128xf32> to vector<8x128xf32>
    %233 = vector.shape_cast %222 : vector<8x128xf32> to vector<1x8x128xf32>
    tpu.vector_store %arg7[%c14_111, %c0_112, %c0_113], %233 {strides = array<i32>} : memref<24x8x128xf32, #tpu.memory_space<vmem>>, vector<1x8x128xf32>,
    %cst_114 = arith.constant 0.000000e+00 : f32
    %234 = vector.broadcast %cst_114 : f32 to vector<8x128xf32>
    %235 = arith.select %224, %234, %222 : vector<8x128xi1>, vector<8x128xf32>
    %236 = vector.extract_strided_slice %9 {offsets = [120, 0], sizes = [8, 128], strides = [1, 1]} : vector<192x128xf32> to vector<8x128xf32>
    %237 = arith.addf %235, %236 : vector<8x128xf32>
    %cst_115 = arith.constant 1.000000e+00 : f32
    %238 = vector.broadcast %cst_115 : f32 to vector<8x128xf32>
    %239 = arith.cmpf ogt, %237, %238 : vector<8x128xf32>
    %240 = arith.extui %239 : vector<8x128xi1> to vector<8x128xi32>
    %241 = arith.sitofp %240 : vector<8x128xi32> to vector<8x128xf32>
    %242 = arith.truncf %241 : vector<8x128xf32> to vector<8x128xbf16>
    %c15 = arith.constant 15 : index
    %c0_116 = arith.constant 0 : index
    %c0_117 = arith.constant 0 : index
    %243 = vector.load %arg6[%c15, %c0_116, %c0_117] : memref<24x8x128xbf16, #tpu.memory_space<vmem>>, vector<1x8x128xbf16>
    %244 = vector.shape_cast %243 : vector<1x8x128xbf16> to vector<8x128xbf16>
    %245 = vector.shape_cast %242 : vector<8x128xbf16> to vector<1x8x128xbf16>
    tpu.vector_store %arg6[%c15, %c0_116, %c0_117], %245 {strides = array<i32>} : memref<24x8x128xbf16, #tpu.memory_space<vmem>>, vector<1x8x128xbf16>,
    %c15_118 = arith.constant 15 : index
    %c0_119 = arith.constant 0 : index
    %c0_120 = arith.constant 0 : index
    %246 = vector.load %arg7[%c15_118, %c0_119, %c0_120] : memref<24x8x128xf32, #tpu.memory_space<vmem>>, vector<1x8x128xf32>
    %247 = vector.shape_cast %246 : vector<1x8x128xf32> to vector<8x128xf32>
    %248 = vector.shape_cast %237 : vector<8x128xf32> to vector<1x8x128xf32>
    tpu.vector_store %arg7[%c15_118, %c0_119, %c0_120], %248 {strides = array<i32>} : memref<24x8x128xf32, #tpu.memory_space<vmem>>, vector<1x8x128xf32>,
    %cst_121 = arith.constant 0.000000e+00 : f32
    %249 = vector.broadcast %cst_121 : f32 to vector<8x128xf32>
    %250 = arith.select %239, %249, %237 : vector<8x128xi1>, vector<8x128xf32>
    %251 = vector.extract_strided_slice %9 {offsets = [128, 0], sizes = [8, 128], strides = [1, 1]} : vector<192x128xf32> to vector<8x128xf32>
    %252 = arith.addf %250, %251 : vector<8x128xf32>
    %cst_122 = arith.constant 1.000000e+00 : f32
    %253 = vector.broadcast %cst_122 : f32 to vector<8x128xf32>
    %254 = arith.cmpf ogt, %252, %253 : vector<8x128xf32>
    %255 = arith.extui %254 : vector<8x128xi1> to vector<8x128xi32>
    %256 = arith.sitofp %255 : vector<8x128xi32> to vector<8x128xf32>
    %257 = arith.truncf %256 : vector<8x128xf32> to vector<8x128xbf16>
    %c16 = arith.constant 16 : index
    %c0_123 = arith.constant 0 : index
    %c0_124 = arith.constant 0 : index
    %258 = vector.load %arg6[%c16, %c0_123, %c0_124] : memref<24x8x128xbf16, #tpu.memory_space<vmem>>, vector<1x8x128xbf16>
    %259 = vector.shape_cast %258 : vector<1x8x128xbf16> to vector<8x128xbf16>
    %260 = vector.shape_cast %257 : vector<8x128xbf16> to vector<1x8x128xbf16>
    tpu.vector_store %arg6[%c16, %c0_123, %c0_124], %260 {strides = array<i32>} : memref<24x8x128xbf16, #tpu.memory_space<vmem>>, vector<1x8x128xbf16>,
    %c16_125 = arith.constant 16 : index
    %c0_126 = arith.constant 0 : index
    %c0_127 = arith.constant 0 : index
    %261 = vector.load %arg7[%c16_125, %c0_126, %c0_127] : memref<24x8x128xf32, #tpu.memory_space<vmem>>, vector<1x8x128xf32>
    %262 = vector.shape_cast %261 : vector<1x8x128xf32> to vector<8x128xf32>
    %263 = vector.shape_cast %252 : vector<8x128xf32> to vector<1x8x128xf32>
    tpu.vector_store %arg7[%c16_125, %c0_126, %c0_127], %263 {strides = array<i32>} : memref<24x8x128xf32, #tpu.memory_space<vmem>>, vector<1x8x128xf32>,
    %cst_128 = arith.constant 0.000000e+00 : f32
    %264 = vector.broadcast %cst_128 : f32 to vector<8x128xf32>
    %265 = arith.select %254, %264, %252 : vector<8x128xi1>, vector<8x128xf32>
    %266 = vector.extract_strided_slice %9 {offsets = [136, 0], sizes = [8, 128], strides = [1, 1]} : vector<192x128xf32> to vector<8x128xf32>
    %267 = arith.addf %265, %266 : vector<8x128xf32>
    %cst_129 = arith.constant 1.000000e+00 : f32
    %268 = vector.broadcast %cst_129 : f32 to vector<8x128xf32>
    %269 = arith.cmpf ogt, %267, %268 : vector<8x128xf32>
    %270 = arith.extui %269 : vector<8x128xi1> to vector<8x128xi32>
    %271 = arith.sitofp %270 : vector<8x128xi32> to vector<8x128xf32>
    %272 = arith.truncf %271 : vector<8x128xf32> to vector<8x128xbf16>
    %c17 = arith.constant 17 : index
    %c0_130 = arith.constant 0 : index
    %c0_131 = arith.constant 0 : index
    %273 = vector.load %arg6[%c17, %c0_130, %c0_131] : memref<24x8x128xbf16, #tpu.memory_space<vmem>>, vector<1x8x128xbf16>
    %274 = vector.shape_cast %273 : vector<1x8x128xbf16> to vector<8x128xbf16>
    %275 = vector.shape_cast %272 : vector<8x128xbf16> to vector<1x8x128xbf16>
    tpu.vector_store %arg6[%c17, %c0_130, %c0_131], %275 {strides = array<i32>} : memref<24x8x128xbf16, #tpu.memory_space<vmem>>, vector<1x8x128xbf16>,
    %c17_132 = arith.constant 17 : index
    %c0_133 = arith.constant 0 : index
    %c0_134 = arith.constant 0 : index
    %276 = vector.load %arg7[%c17_132, %c0_133, %c0_134] : memref<24x8x128xf32, #tpu.memory_space<vmem>>, vector<1x8x128xf32>
    %277 = vector.shape_cast %276 : vector<1x8x128xf32> to vector<8x128xf32>
    %278 = vector.shape_cast %267 : vector<8x128xf32> to vector<1x8x128xf32>
    tpu.vector_store %arg7[%c17_132, %c0_133, %c0_134], %278 {strides = array<i32>} : memref<24x8x128xf32, #tpu.memory_space<vmem>>, vector<1x8x128xf32>,
    %cst_135 = arith.constant 0.000000e+00 : f32
    %279 = vector.broadcast %cst_135 : f32 to vector<8x128xf32>
    %280 = arith.select %269, %279, %267 : vector<8x128xi1>, vector<8x128xf32>
    %281 = vector.extract_strided_slice %9 {offsets = [144, 0], sizes = [8, 128], strides = [1, 1]} : vector<192x128xf32> to vector<8x128xf32>
    %282 = arith.addf %280, %281 : vector<8x128xf32>
    %cst_136 = arith.constant 1.000000e+00 : f32
    %283 = vector.broadcast %cst_136 : f32 to vector<8x128xf32>
    %284 = arith.cmpf ogt, %282, %283 : vector<8x128xf32>
    %285 = arith.extui %284 : vector<8x128xi1> to vector<8x128xi32>
    %286 = arith.sitofp %285 : vector<8x128xi32> to vector<8x128xf32>
    %287 = arith.truncf %286 : vector<8x128xf32> to vector<8x128xbf16>
    %c18 = arith.constant 18 : index
    %c0_137 = arith.constant 0 : index
    %c0_138 = arith.constant 0 : index
    %288 = vector.load %arg6[%c18, %c0_137, %c0_138] : memref<24x8x128xbf16, #tpu.memory_space<vmem>>, vector<1x8x128xbf16>
    %289 = vector.shape_cast %288 : vector<1x8x128xbf16> to vector<8x128xbf16>
    %290 = vector.shape_cast %287 : vector<8x128xbf16> to vector<1x8x128xbf16>
    tpu.vector_store %arg6[%c18, %c0_137, %c0_138], %290 {strides = array<i32>} : memref<24x8x128xbf16, #tpu.memory_space<vmem>>, vector<1x8x128xbf16>,
    %c18_139 = arith.constant 18 : index
    %c0_140 = arith.constant 0 : index
    %c0_141 = arith.constant 0 : index
    %291 = vector.load %arg7[%c18_139, %c0_140, %c0_141] : memref<24x8x128xf32, #tpu.memory_space<vmem>>, vector<1x8x128xf32>
    %292 = vector.shape_cast %291 : vector<1x8x128xf32> to vector<8x128xf32>
    %293 = vector.shape_cast %282 : vector<8x128xf32> to vector<1x8x128xf32>
    tpu.vector_store %arg7[%c18_139, %c0_140, %c0_141], %293 {strides = array<i32>} : memref<24x8x128xf32, #tpu.memory_space<vmem>>, vector<1x8x128xf32>,
    %cst_142 = arith.constant 0.000000e+00 : f32
    %294 = vector.broadcast %cst_142 : f32 to vector<8x128xf32>
    %295 = arith.select %284, %294, %282 : vector<8x128xi1>, vector<8x128xf32>
    %296 = vector.extract_strided_slice %9 {offsets = [152, 0], sizes = [8, 128], strides = [1, 1]} : vector<192x128xf32> to vector<8x128xf32>
    %297 = arith.addf %295, %296 : vector<8x128xf32>
    %cst_143 = arith.constant 1.000000e+00 : f32
    %298 = vector.broadcast %cst_143 : f32 to vector<8x128xf32>
    %299 = arith.cmpf ogt, %297, %298 : vector<8x128xf32>
    %300 = arith.extui %299 : vector<8x128xi1> to vector<8x128xi32>
    %301 = arith.sitofp %300 : vector<8x128xi32> to vector<8x128xf32>
    %302 = arith.truncf %301 : vector<8x128xf32> to vector<8x128xbf16>
    %c19 = arith.constant 19 : index
    %c0_144 = arith.constant 0 : index
    %c0_145 = arith.constant 0 : index
    %303 = vector.load %arg6[%c19, %c0_144, %c0_145] : memref<24x8x128xbf16, #tpu.memory_space<vmem>>, vector<1x8x128xbf16>
    %304 = vector.shape_cast %303 : vector<1x8x128xbf16> to vector<8x128xbf16>
    %305 = vector.shape_cast %302 : vector<8x128xbf16> to vector<1x8x128xbf16>
    tpu.vector_store %arg6[%c19, %c0_144, %c0_145], %305 {strides = array<i32>} : memref<24x8x128xbf16, #tpu.memory_space<vmem>>, vector<1x8x128xbf16>,
    %c19_146 = arith.constant 19 : index
    %c0_147 = arith.constant 0 : index
    %c0_148 = arith.constant 0 : index
    %306 = vector.load %arg7[%c19_146, %c0_147, %c0_148] : memref<24x8x128xf32, #tpu.memory_space<vmem>>, vector<1x8x128xf32>
    %307 = vector.shape_cast %306 : vector<1x8x128xf32> to vector<8x128xf32>
    %308 = vector.shape_cast %297 : vector<8x128xf32> to vector<1x8x128xf32>
    tpu.vector_store %arg7[%c19_146, %c0_147, %c0_148], %308 {strides = array<i32>} : memref<24x8x128xf32, #tpu.memory_space<vmem>>, vector<1x8x128xf32>,
    %cst_149 = arith.constant 0.000000e+00 : f32
    %309 = vector.broadcast %cst_149 : f32 to vector<8x128xf32>
    %310 = arith.select %299, %309, %297 : vector<8x128xi1>, vector<8x128xf32>
    %311 = vector.extract_strided_slice %9 {offsets = [160, 0], sizes = [8, 128], strides = [1, 1]} : vector<192x128xf32> to vector<8x128xf32>
    %312 = arith.addf %310, %311 : vector<8x128xf32>
    %cst_150 = arith.constant 1.000000e+00 : f32
    %313 = vector.broadcast %cst_150 : f32 to vector<8x128xf32>
    %314 = arith.cmpf ogt, %312, %313 : vector<8x128xf32>
    %315 = arith.extui %314 : vector<8x128xi1> to vector<8x128xi32>
    %316 = arith.sitofp %315 : vector<8x128xi32> to vector<8x128xf32>
    %317 = arith.truncf %316 : vector<8x128xf32> to vector<8x128xbf16>
    %c20 = arith.constant 20 : index
    %c0_151 = arith.constant 0 : index
    %c0_152 = arith.constant 0 : index
    %318 = vector.load %arg6[%c20, %c0_151, %c0_152] : memref<24x8x128xbf16, #tpu.memory_space<vmem>>, vector<1x8x128xbf16>
    %319 = vector.shape_cast %318 : vector<1x8x128xbf16> to vector<8x128xbf16>
    %320 = vector.shape_cast %317 : vector<8x128xbf16> to vector<1x8x128xbf16>
    tpu.vector_store %arg6[%c20, %c0_151, %c0_152], %320 {strides = array<i32>} : memref<24x8x128xbf16, #tpu.memory_space<vmem>>, vector<1x8x128xbf16>,
    %c20_153 = arith.constant 20 : index
    %c0_154 = arith.constant 0 : index
    %c0_155 = arith.constant 0 : index
    %321 = vector.load %arg7[%c20_153, %c0_154, %c0_155] : memref<24x8x128xf32, #tpu.memory_space<vmem>>, vector<1x8x128xf32>
    %322 = vector.shape_cast %321 : vector<1x8x128xf32> to vector<8x128xf32>
    %323 = vector.shape_cast %312 : vector<8x128xf32> to vector<1x8x128xf32>
    tpu.vector_store %arg7[%c20_153, %c0_154, %c0_155], %323 {strides = array<i32>} : memref<24x8x128xf32, #tpu.memory_space<vmem>>, vector<1x8x128xf32>,
    %cst_156 = arith.constant 0.000000e+00 : f32
    %324 = vector.broadcast %cst_156 : f32 to vector<8x128xf32>
    %325 = arith.select %314, %324, %312 : vector<8x128xi1>, vector<8x128xf32>
    %326 = vector.extract_strided_slice %9 {offsets = [168, 0], sizes = [8, 128], strides = [1, 1]} : vector<192x128xf32> to vector<8x128xf32>
    %327 = arith.addf %325, %326 : vector<8x128xf32>
    %cst_157 = arith.constant 1.000000e+00 : f32
    %328 = vector.broadcast %cst_157 : f32 to vector<8x128xf32>
    %329 = arith.cmpf ogt, %327, %328 : vector<8x128xf32>
    %330 = arith.extui %329 : vector<8x128xi1> to vector<8x128xi32>
    %331 = arith.sitofp %330 : vector<8x128xi32> to vector<8x128xf32>
    %332 = arith.truncf %331 : vector<8x128xf32> to vector<8x128xbf16>
    %c21 = arith.constant 21 : index
    %c0_158 = arith.constant 0 : index
    %c0_159 = arith.constant 0 : index
    %333 = vector.load %arg6[%c21, %c0_158, %c0_159] : memref<24x8x128xbf16, #tpu.memory_space<vmem>>, vector<1x8x128xbf16>
    %334 = vector.shape_cast %333 : vector<1x8x128xbf16> to vector<8x128xbf16>
    %335 = vector.shape_cast %332 : vector<8x128xbf16> to vector<1x8x128xbf16>
    tpu.vector_store %arg6[%c21, %c0_158, %c0_159], %335 {strides = array<i32>} : memref<24x8x128xbf16, #tpu.memory_space<vmem>>, vector<1x8x128xbf16>,
    %c21_160 = arith.constant 21 : index
    %c0_161 = arith.constant 0 : index
    %c0_162 = arith.constant 0 : index
    %336 = vector.load %arg7[%c21_160, %c0_161, %c0_162] : memref<24x8x128xf32, #tpu.memory_space<vmem>>, vector<1x8x128xf32>
    %337 = vector.shape_cast %336 : vector<1x8x128xf32> to vector<8x128xf32>
    %338 = vector.shape_cast %327 : vector<8x128xf32> to vector<1x8x128xf32>
    tpu.vector_store %arg7[%c21_160, %c0_161, %c0_162], %338 {strides = array<i32>} : memref<24x8x128xf32, #tpu.memory_space<vmem>>, vector<1x8x128xf32>,
    %cst_163 = arith.constant 0.000000e+00 : f32
    %339 = vector.broadcast %cst_163 : f32 to vector<8x128xf32>
    %340 = arith.select %329, %339, %327 : vector<8x128xi1>, vector<8x128xf32>
    %341 = vector.extract_strided_slice %9 {offsets = [176, 0], sizes = [8, 128], strides = [1, 1]} : vector<192x128xf32> to vector<8x128xf32>
    %342 = arith.addf %340, %341 : vector<8x128xf32>
    %cst_164 = arith.constant 1.000000e+00 : f32
    %343 = vector.broadcast %cst_164 : f32 to vector<8x128xf32>
    %344 = arith.cmpf ogt, %342, %343 : vector<8x128xf32>
    %345 = arith.extui %344 : vector<8x128xi1> to vector<8x128xi32>
    %346 = arith.sitofp %345 : vector<8x128xi32> to vector<8x128xf32>
    %347 = arith.truncf %346 : vector<8x128xf32> to vector<8x128xbf16>
    %c22 = arith.constant 22 : index
    %c0_165 = arith.constant 0 : index
    %c0_166 = arith.constant 0 : index
    %348 = vector.load %arg6[%c22, %c0_165, %c0_166] : memref<24x8x128xbf16, #tpu.memory_space<vmem>>, vector<1x8x128xbf16>
    %349 = vector.shape_cast %348 : vector<1x8x128xbf16> to vector<8x128xbf16>
    %350 = vector.shape_cast %347 : vector<8x128xbf16> to vector<1x8x128xbf16>
    tpu.vector_store %arg6[%c22, %c0_165, %c0_166], %350 {strides = array<i32>} : memref<24x8x128xbf16, #tpu.memory_space<vmem>>, vector<1x8x128xbf16>,
    %c22_167 = arith.constant 22 : index
    %c0_168 = arith.constant 0 : index
    %c0_169 = arith.constant 0 : index
    %351 = vector.load %arg7[%c22_167, %c0_168, %c0_169] : memref<24x8x128xf32, #tpu.memory_space<vmem>>, vector<1x8x128xf32>
    %352 = vector.shape_cast %351 : vector<1x8x128xf32> to vector<8x128xf32>
    %353 = vector.shape_cast %342 : vector<8x128xf32> to vector<1x8x128xf32>
    tpu.vector_store %arg7[%c22_167, %c0_168, %c0_169], %353 {strides = array<i32>} : memref<24x8x128xf32, #tpu.memory_space<vmem>>, vector<1x8x128xf32>,
    %cst_170 = arith.constant 0.000000e+00 : f32
    %354 = vector.broadcast %cst_170 : f32 to vector<8x128xf32>
    %355 = arith.select %344, %354, %342 : vector<8x128xi1>, vector<8x128xf32>
    %356 = vector.extract_strided_slice %9 {offsets = [184, 0], sizes = [8, 128], strides = [1, 1]} : vector<192x128xf32> to vector<8x128xf32>
    %357 = arith.addf %355, %356 : vector<8x128xf32>
    %cst_171 = arith.constant 1.000000e+00 : f32
    %358 = vector.broadcast %cst_171 : f32 to vector<8x128xf32>
    %359 = arith.cmpf ogt, %357, %358 : vector<8x128xf32>
    %360 = arith.extui %359 : vector<8x128xi1> to vector<8x128xi32>
    %361 = arith.sitofp %360 : vector<8x128xi32> to vector<8x128xf32>
    %362 = arith.truncf %361 : vector<8x128xf32> to vector<8x128xbf16>
    %c23 = arith.constant 23 : index
    %c0_172 = arith.constant 0 : index
    %c0_173 = arith.constant 0 : index
    %363 = vector.load %arg6[%c23, %c0_172, %c0_173] : memref<24x8x128xbf16, #tpu.memory_space<vmem>>, vector<1x8x128xbf16>
    %364 = vector.shape_cast %363 : vector<1x8x128xbf16> to vector<8x128xbf16>
    %365 = vector.shape_cast %362 : vector<8x128xbf16> to vector<1x8x128xbf16>
    tpu.vector_store %arg6[%c23, %c0_172, %c0_173], %365 {strides = array<i32>} : memref<24x8x128xbf16, #tpu.memory_space<vmem>>, vector<1x8x128xbf16>,
    %c23_174 = arith.constant 23 : index
    %c0_175 = arith.constant 0 : index
    %c0_176 = arith.constant 0 : index
    %366 = vector.load %arg7[%c23_174, %c0_175, %c0_176] : memref<24x8x128xf32, #tpu.memory_space<vmem>>, vector<1x8x128xf32>
    %367 = vector.shape_cast %366 : vector<1x8x128xf32> to vector<8x128xf32>
    %368 = vector.shape_cast %357 : vector<8x128xf32> to vector<1x8x128xf32>
    tpu.vector_store %arg7[%c23_174, %c0_175, %c0_176], %368 {strides = array<i32>} : memref<24x8x128xf32, #tpu.memory_space<vmem>>, vector<1x8x128xf32>,
    %cst_177 = arith.constant 0.000000e+00 : f32
    %369 = vector.broadcast %cst_177 : f32 to vector<8x128xf32>
    %370 = arith.select %359, %369, %357 : vector<8x128xi1>, vector<8x128xf32>
    %c0_178 = arith.constant 0 : index
    %c0_179 = arith.constant 0 : index
    %371 = vector.load %arg9[%c0_178, %c0_179] : memref<8x128xf32, #tpu.memory_space<vmem>>, vector<8x128xf32>
    tpu.vector_store %arg9[%c0_178, %c0_179], %370 {strides = array<i32>} : memref<8x128xf32, #tpu.memory_space<vmem>>, vector<8x128xf32>,
    %c0_180 = arith.constant 0 : index
    %c0_181 = arith.constant 0 : index
    %372 = vector.load %arg8[%c0_180, %c0_181] : memref<8x128xf32, #tpu.memory_space<vmem>>, vector<8x128xf32>
    tpu.vector_store %arg8[%c0_180, %c0_181], %357 {strides = array<i32>} : memref<8x128xf32, #tpu.memory_space<vmem>>, vector<8x128xf32>,
    return
  }
  func.func @transform_0(%arg0: i32, %arg1: i32) -> (i32, i32, i32) {
    %c0_i32 = arith.constant 0 : i32
    %c0_i32_0 = arith.constant 0 : i32
    %c0_i32_1 = arith.constant 0 : i32
    return %arg1, %c0_i32, %c0_i32_0 : i32, i32, i32
  }
  func.func @transform_1(%arg0: i32, %arg1: i32) -> (i32, i32) {
    %c0_i32 = arith.constant 0 : i32
    %c0_i32_0 = arith.constant 0 : i32
    return %c0_i32, %arg0 : i32, i32
  }
  func.func @transform_2(%arg0: i32, %arg1: i32) -> (i32, i32) {
    %c0_i32 = arith.constant 0 : i32
    %c0_i32_0 = arith.constant 0 : i32
    return %c0_i32, %arg0 : i32, i32
  }
  func.func @transform_3(%arg0: i32, %arg1: i32) -> (i32, i32) {
    %c0_i32 = arith.constant 0 : i32
    %c0_i32_0 = arith.constant 0 : i32
    return %c0_i32, %arg0 : i32, i32
  }
  func.func @transform_4(%arg0: i32, %arg1: i32) -> (i32, i32, i32) {
    %c0_i32 = arith.constant 0 : i32
    %c0_i32_0 = arith.constant 0 : i32
    return %arg1, %c0_i32, %arg0 : i32, i32, i32
  }
  func.func @transform_5(%arg0: i32, %arg1: i32) -> (i32, i32, i32) {
    %c0_i32 = arith.constant 0 : i32
    %c0_i32_0 = arith.constant 0 : i32
    return %arg1, %c0_i32, %arg0 : i32, i32, i32
  }
  func.func @transform_6(%arg0: i32, %arg1: i32) -> (i32, i32) {
    %c0_i32 = arith.constant 0 : i32
    %c0_i32_0 = arith.constant 0 : i32
    return %c0_i32, %arg0 : i32, i32
  }
}

</mosaic_0001>

<bundles_post_ra>
// kernel: tpu_custom_call.1
= control target key start
LH: loop header
LB: loop body
LE: loop exit
PB: predicated region body
PF: predicated region fallthrough
CT: control target
= control target key end

     0   :  { %s2475_s0 = inlined_call_operand.hbm [shape: bf16[48,8,128], index: 0, kind: input, shape index: {}]   ;;  %s2476_s1 = inlined_call_operand.hbm [shape: bf16[128,256], index: 1, kind: input, shape index: {}]   ;;  %s2477_s2 = inlined_call_operand.hbm [shape: f32[1,256], index: 2, kind: input, shape index: {}]   ;;  %s2478_s3 = inlined_call_operand.hbm [shape: f32[8,256], index: 3, kind: input, shape index: {}]   ;;  %s2479_s4 = inlined_call_operand.hbm [shape: bf16[48,8,256], index: 4, kind: output, shape index: {0}]   ;;  %s2480_s5 = inlined_call_operand.hbm [shape: f32[48,8,256], index: 5, kind: output, shape index: {1}]   ;;  %s2481_s6 = inlined_call_operand.hbm [shape: f32[8,256], index: 6, kind: output, shape index: {2}]  }
   0x1   :  { %2504 = sst [smem:[#allocation36_spill]] %s2475_s0 }
   0x2   :  { %2505 = sst [smem:[#allocation37_spill]] %s2476_s1 }
   0x3   :  { %2506 = sst [smem:[#allocation38_spill]] %s2477_s2 }
   0x4   :  { %2507 = sst [smem:[#allocation39_spill]] %s2479_s4 }
   0x5   :  { %2508 = sst [smem:[#allocation40_spill]] %s2480_s5 }
   0x6   :  { %2509 = sst [smem:[#allocation41_spill]] %s2481_s6 }
   0x7   :  { %12 = vsyncpa [#allocation4], 0 }
   0x8   :  { %14 = vsyncpa [#allocation4 + $0x1], 0 }
   0x9   :  { %15 = vsyncpa [#allocation7], 0 }
   0xa   :  { %17 = vsyncpa [#allocation7 + $0x1], 0 }
   0xb   :  { %18 = vsyncpa [#allocation10], 0 }
   0xc   :  { %20 = vsyncpa [#allocation10 + $0x1], 0 }
   0xd   :  { %21 = vsyncpa [#allocation5], 0 }
   0xe   :  { %23 = vsyncpa [#allocation5 + $0x1], 0 }
   0xf   :  { %24 = vsyncpa [#allocation13], 0 }
  0x10   :  { %26 = vsyncpa [#allocation13 + $0x1], 0  ;;  %s1943_s21 = smov 0   ;;  %s1945_s22 = smov 0  }
  0x11   :  { %s1947_s23 = smov 0   ;;  %s1949_s24 = smov 0  }
  0x12   :  { %s1951_s25 = smov 0   ;;  %s1953_s26 = smov 0  }
  0x13   :  { %s1955_s27 = smov 0   ;;  %s1957_s28 = smov 0  }
  0x14   :  { %s1959_s29 = smov 0   ;;  %s1961_s30 = smov 0  }
  0x15   :  { %s1963_s7 = smov 0   ;;  %s1965_s8 = smov 0  }
  0x16   :  { %s1967_s9 = smov 0   ;;  %s1969_s10 = smov 0  }
  0x17 LB: > { %2510 = sst [smem:[#allocation21_spill]] %s1845_s21  ;;  %s2482_s11 = sadd.s32 4294967294, %s1897_s10   ;;  %s1897_s10 = sphi %s1969_s10, %s32_s10   ;;  %s1893_s9 = sphi %s1967_s9, %s2578_s9   ;;  %s1889_s8 = sphi %s1965_s8, %s2577_s8   ;;  %s1885_s7 = sphi %s1963_s7, %s2576_s7   ;;  %s1881_s30 = sphi %s1961_s30, %s2575_s30   ;;  %s1877_s29 = sphi %s1959_s29, %s2574_s29   ;;  %s1873_s28 = sphi %s1957_s28, %s2573_s28   ;;  %s1869_s27 = sphi %s1955_s27, %s2572_s27   ;;  %s1865_s26 = sphi %s1953_s26, %s2562_s26   ;;  %s1861_s25 = sphi %s1951_s25, %s2571_s25   ;;  %s1857_s24 = sphi %s1949_s24, %s2570_s24   ;;  %s1853_s23 = sphi %s1947_s23, %s2560_s23   ;;  %s1849_s22 = sphi %s1945_s22, %s2569_s22   ;;  %s1845_s21 = sphi %s1943_s21, %s2568_s21  }
  0x18   : > { %2511 = sst [smem:[#allocation22_spill]] %s1853_s23  ;;  %p59_p0 = scmp.eq.s32.totalorder %s1897_s10, 0 }
  0x19   : > { %2512 = sst [smem:[#allocation23_spill]] %s1865_s26  ;;  %p2492_p1 = scmp.ne.s32.totalorder %s1865_s26, %s1861_s25 }
  0x1a   : > { %2513 = sst [smem:[#allocation24_spill]] %s1877_s29  ;;  %p90_p2 = scmp.ne.s32.totalorder %s1861_s25, %s1857_s24 }
  0x1b   : > { %2514 = sst [smem:[#allocation25_spill]] %s1881_s30  ;;  %p2021_p3 = scmp.eq.s32.totalorder %s2482_s11, 3 }
  0x1c   : > { %2515 = sst [smem:[#allocation26_spill]] %s1885_s7  ;;  %p2030_p4 = por %p2492_p1, %p59_p0 }
  0x1d   : > { %2516 = sst [smem:[#allocation27_spill]] %s1897_s10  ;;  %p2487_p5 = scmp.lt.s32.totalorder %s1897_s10, 4 }
  0x1e   : > { %p2040_p6 = por %p2021_p3, %p90_p2  ;;  %s270_s15 = sand.u32 1, %s1897_s10  }
  0x1f   : > { %s2046_s16 = sand.u32 1, %s1865_s26   ;;  %s1181_s18 = sshll.u32 %s1893_s9, 2 }
  0x20   : > { %s2519_s14 = scalar_select %p2040_p6, 1, 0 }
  0x21   : > { %s1180_s17 = sshll.u32 %s2046_s16, 6  ;;  %s2521_s1 = sld [smem:[#allocation37_spill]] }
  0x22   : > { %2520 = sst [smem:[#allocation28_spill]] %s2519_s14  ;;  %s274_s4 = scalar_lea.vmem [#allocation6], %s1180_s17 }
  0x23   : > { %s281_s5 = sshll.u32 %s274_s4, 4  ;;  %p2057_p7 = pnand %p2487_p5, %p2030_p4  ;;  %s282_s5 = int_to_ptr.vmem [resolvable:$true] %s281_s5 }
  0x24   : > { %p1184_p8 = scmp.ge.s32.totalorder %s1897_s10, 1  ;;  %p325_p9 = scmp.lt.s32.totalorder %s1897_s10, 5 }
  0x25   : > { %s1899_s4 = smov 128   ;;  %s2488_s17 = smov 64  }
  0x26   : > { %p2070_p10 = pnand %p1184_p8, %p325_p9  ;;  %s2075_s19 = sadd.s32 4294967295, %s1897_s10  }
  0x27   : > { %s278_s11 = scalar_lea.hbm %s2521_s1, %s1181_s18  ;;  %s2489_s18 = smov 4  }
  0x28   : > { %s279_s6 = sshll.u32 %s278_s11, 4  ;;  %s2063_s11 = scalar_lea.sflag [#allocation7], %s270_s15  ;;  %s280_s6 = int_to_ptr.hbm [resolvable:$true] %s279_s6 }
  0x29   : > { %1418 = dma.hbm_to_vmem [thread:$0]  (!%p2057_p7), %s280_s6, 1024, %s282_s5, %s2063_s11, %s1899_s4, %s2488_s17, %s2489_s18  }
  0x2a   : > { %s41_s15 = sadd.s32 1, %s1889_s8  ;;  %s44_s20 = sadd.s32 1, %s1893_s9 }
  0x2b   : > { %p42_p11 = scmp.ge.s32.totalorder %s41_s15, 2  ;;  %s51_s1 = sadd.s32 1, %s1877_s29 }
  0x2c   : > { %p58_p12 = scmp.ne.s32.totalorder %s1877_s29, %s1873_s28  ;;  %p64_p9 = scmp.ne.s32.totalorder %s1873_s28, %s1869_s27 }
  0x2d   : > { %s2580_s15 = smov (%p42_p11, %s41_s15), 0  ;;  %s2582_s20 = smov (!%p42_p11, %s44_s20), %s1893_s9 }
  0x2e   : > { %2524 = sst [smem:[#allocation29_spill]] %s2580_s15  ;;  %s48_s5 = ssub.s32 %s1889_s8, %s2580_s15 }
  0x2f   : > { %p2089_p13 = por %p59_p0, %p58_p12  ;;  %p46_p4 = scmp.ge.s32.totalorder %s2582_s20, 2 }
  0x30   : > { %p49_p8 = scmp.eq.s32.totalorder %s48_s5, 0  ;;  %p65_p5 = scmp.eq.s32.totalorder %s2075_s19, 0 }
  0x31   : > { %s2584_s20 = smov (%p46_p4, %s2582_s20), 0  ;;  %s77_s27 = sadd.s32 1, %s1865_s26 }
  0x32   : > { %2526 = sst [smem:[#allocation30_spill]] %s2584_s20  ;;  %p2101_p0 = por %p65_p5, %p64_p9 }
  0x33   : > { %s2099_s4 = scalar_select %p49_p8, %s1877_s29, %s51_s1  }
  0x34   : > { %s2528_s17 = scalar_select %p2101_p0, 1, 0 }
  0x35   : > { %2527 = sst [smem:[#allocation31_spill]] %s2099_s4  ;;  %s74_s18 = ssub.s32 %s1893_s9, %s2584_s20 }
  0x36   : > { %p75_p11 = scmp.eq.s32.totalorder %s74_s18, 0  ;;  %p2111_p12 = por %p90_p2, %p65_p5 }
  0x37   : > { %s154_s7 = sor.u32 %s74_s18, %s48_s5  ;;  %s157_s4 = sadd.s32 1, %s1853_s23 }
  0x38   : > { %s2116_s1 = scalar_select %p75_p11, %s1865_s26, %s77_s27  }
  0x39   : > { %p155_p4 = scmp.eq.s32.totalorder %s154_s7, 0  ;;  %p167_p8 = scmp.ne.s32.totalorder %s1853_s23, %s1849_s22 }
  0x3a   : > { %2530 = sst [smem:[#allocation32_spill]] %s2116_s1  ;;  %p168_p9 = scmp.eq.s32.totalorder %s2075_s19, 3 }
  0x3b   : > { %s2123_s30 = scalar_select %p155_p4, %s1853_s23, %s157_s4  }
  0x3c   : > { %p2125_p1 = por %p168_p9, %p167_p8  ;;  %p173_p6 = scmp.ne.s32.totalorder %s1849_s22, %s1845_s21 }
  0x3d   : > { %2531 = sst [smem:[#allocation33_spill]] %s2123_s30  ;;  %p2533_p0 = scmp.ne.s32.totalorder %s1865_s26, %s1861_s25 }
  0x3e   : > { %s248_s18 = sand.u32 1, %s1877_s29   ;;  %p2141_p5 = por %p2021_p3, %p173_p6 }
  0x3f   : > { %p2134_p2 = por %p168_p9, %p2533_p0  ;;  %s1394_s5 = smul.u32 96, %s248_s18 }
  0x40   : > { %s2536_s7 = scalar_select %p2141_p5, 1, 0 }
  0x41   : > { %s2534_s24 = scalar_select %p2134_p2, 1, 0 }
  0x42   : > { %2537 = sst [smem:[#allocation35_spill]] %s2536_s7  ;;  %p2538_p11 = scmp.lt.s32.totalorder %s1897_s10, 4 }
  0x43   : > { %2535 = sst [smem:[#allocation34_spill]] %s2534_s24  ;;  %s1347_s4 = smul.u32 96, %s1889_s8 }
  0x44   : > { %p1413_p4 = pnand %p2538_p11, %p2089_p13  ;;  %s2539_s0 = sld [smem:[#allocation36_spill]] }
  0x45   : > { %s252_s30 = scalar_lea.vmem [#allocation3], %s1394_s5  ;;  %s2540_s2 = sld [smem:[#allocation38_spill]] }
  0x46   : > { %s260_s29 = sshll.u32 %s252_s30, 4  ;;  %s249_s21 = scalar_lea.sflag [#allocation4], %s248_s18  ;;  %s261_s29 = int_to_ptr.vmem [resolvable:$true] %s260_s29 }
  0x47   : > { %s2541_s10 = smov 4   ;;  %s2542_s24 = smov 64  }
  0x48   : > { %s294_s27 = scalar_lea.vmem [#allocation8], %s2046_s16  ;;  %s1183_s30 = sshll.u32 %s1893_s9, 3 }
  0x49   : > { %s316_s23 = scalar_lea.hbm %s2478_s3, %s1183_s30  ;;  %p2543_p3 = scmp.ne.s32.totalorder (!%p2070_p10), %s2528_s17, 0 }
  0x4a   : > { %s257_s26 = scalar_lea.hbm %s2539_s0, %s1347_s4  ;;  %s301_s4 = sshll.u32 %s294_s27, 4  ;;  %s302_s4 = int_to_ptr.vmem [resolvable:$true] %s301_s4 }
  0x4b   : > { %s258_s12 = sshll.u32 %s257_s26, 4  ;;  %s297_s6 = scalar_lea.hbm %s2540_s2, %s1893_s9  ;;  %s259_s12 = int_to_ptr.hbm [resolvable:$true] %s258_s12 }
  0x4c   : > { %1415 = dma.hbm_to_vmem [thread:$0]  (!%p1413_p4), %s259_s12, 1536, %s261_s29, %s249_s21, %s2542_s24, %s2542_s24, %s2541_s10  }
  0x4d   : > { %s299_s1 = sshll.u32 %s297_s6, 4  ;;  %s1182_s26 = sshll.u32 %s2046_s16, 3  ;;  %s300_s1 = int_to_ptr.hbm [resolvable:$true] %s299_s1 }
  0x4e   : > { %1421 = dma.hbm_to_vmem [thread:$0]  (!%p2057_p7), %s300_s1, 16, %s302_s4, %s2063_s11  }
  0x4f   : > { %s312_s18 = scalar_lea.vmem [#allocation9], %s1182_s26  ;;  %s318_s2 = sshll.u32 %s316_s23, 4  ;;  %s319_s2 = int_to_ptr.hbm [resolvable:$true] %s318_s2 }
  0x50   : > { %s320_s7 = sshll.u32 %s312_s18, 4  ;;  %s309_s21 = scalar_lea.sflag [#allocation10], %s2046_s16  ;;  %s321_s7 = int_to_ptr.vmem [resolvable:$true] %s320_s7 }
  0x51   : > { %1424 = dma.hbm_to_vmem [thread:$0]  (!%p2057_p7), %s319_s2, 128, %s321_s7, %s309_s21  }
  0x52   : > { %329 = sbr.rel (%p2070_p10) target bundleno = 421 (0x1a5), region = 36  ;;  %s331_s29 = sand.u32 (!%p2070_p10), 1, %s1873_s28  }
  0x53   : > { %s1395_s10 = smul.u32 (!%p2070_p10), 96, %s331_s29  ;;  %s332_s11 = scalar_lea.sflag (!%p2070_p10), [#allocation4], %s331_s29 }
  0x55   : > { %s2175_s24 = scalar_lea.vmem (!%p2070_p10), [#allocation3], %s1395_s10 }
  0x57   : > { %1820 = dma.done.wait (%p2543_p3), %s332_s11, 1536  }
  0x58   : > { %1822 = vsyncadd (%p2543_p3), %s332_s11, 4294965760  ;;  %s341_s0 = sand.u32 1, %s2075_s19   ;;  %s2183_s2 = sand.u32 1, %s1861_s25  }
  0x59   : > { %s1185_s14 = sshll.u32 %s2183_s2, 6  ;;  %s342_s16 = scalar_lea.sflag [#allocation7], %s341_s0 }
  0x5a   : > { %s2188_s13 = scalar_lea.vmem [#allocation6], %s1185_s14 }
  0x5b   : > { %1824 = dma.done.wait (%p2111_p12), %s342_s16, 1040  }
  0x5c   : > { %1826 = vsyncadd (%p2111_p12), %s342_s16, 4294966256  ;;  %s1186_s17 = sshll.u32 %s2183_s2, 3  ;;  %s354_s12 = scalar_lea.vmem [#allocation8], %s2183_s2 }
  0x5d   : > { %s361_s6 = scalar_lea.sflag [#allocation10], %s2183_s2  ;;  %s364_s1 = scalar_lea.vmem [#allocation9], %s1186_s17 }
  0x5e   : > { %1828 = dma.done.wait (%p2111_p12), %s361_s6, 128  }
  0x5f   : > { %1830 = vsyncadd (%p2111_p12), %s361_s6, 4294967168  ;;  %s2202_s27 = sand.u32 1, %s1849_s22   ;;  %s2210_s23 = scalar_lea.vmem [#allocation14], %s1186_s17 }
  0x60   : > { %s1396_s4 = smul.u32 96, %s2202_s27  ;;  %s2544_s18 = sld [smem:[#allocation25_spill]] }
  0x61   : > { %s1397_s26 = smul.u32 192, %s2202_s27 }
  0x62   : > { %s2206_s30 = scalar_lea.vmem [#allocation11], %s1396_s4 }
  0x63   : > { %s2208_s5 = scalar_lea.vmem [#allocation12], %s1397_s26 }
  0x66   : > { %p1188_p6 = scmp.ne.s32.totalorder %s2544_s18, 0 }
  0x68   : > { %424 = sbr.rel (%p1188_p6) target bundleno = 111 (0x6f), region = 56 }
  0x6d   : > { %v425_v0 = vld [vmem:[%s364_s1] sm:$0xff] }
  0x6e   : > { %426 = vst [vmem:[#allocation2] sm:$0xff] %v425_v0 }
  0x6f PF: > { %v1367_v1 = vld [vmem:[%s2188_s13 + $0x38] sm:$0xff]  ;;  %v1366_v2 = vld [vmem:[%s2188_s13 + $0x30] sm:$0xff]  ;;  %v1365_v3 = vld [vmem:[%s2188_s13 + $0x28] sm:$0xff]  ;;  %v1902_v26 = vmov 0.0   ;;  %s2545_s15 = sld [smem:[#allocation25_spill]]  ;;  %s945_s16 = sshll.u32 %s2208_s5, 4  ;;  %s2342_s16 = int_to_ptr.vmem [resolvable:$true] %s945_s16 }
  0x70   : > { %591 = vmatpush.bf16.msra.mxu0 %v1367_v1  ;;  %1370 = vmatpush.bf16.msra.mxu1 %v1367_v1  ;;  %v1364_v4 = vld [vmem:[%s2188_s13 + $0x20] sm:$0xff]  ;;  %v1363_v5 = vld [vmem:[%s2188_s13 + $0x18] sm:$0xff]  ;;  %v1362_v6 = vld [vmem:[%s2188_s13 + $0x10] sm:$0xff]  ;;  %s2546_s7 = sld [smem:[#allocation26_spill]] }
  0x71   : > { %1371 = vmatpush.bf16.msra.mxu2 %v1367_v1  ;;  %1372 = vmatpush.bf16.msra.mxu3 %v1367_v1  ;;  %v1361_v7 = vld [vmem:[%s2188_s13 + $0x8] sm:$0xff]  ;;  %v1360_v8 = vld [vmem:[%s2188_s13] sm:$0xff]  ;;  %v1351_v10 = vld [vmem:[%s2175_s24 + $0x18] sm:$0xff]  ;;  %s2547_s2 = sld [smem:[#allocation40_spill]] }
  0x72   : > { %v1348_v9 = vld [vmem:[%s2175_s24] sm:$0xff]  ;;  %v1354_v11 = vld [vmem:[%s2175_s24 + $0x30] sm:$0xff]  ;;  %v1357_v12 = vld [vmem:[%s2175_s24 + $0x48] sm:$0xff]  ;;  %s2548_s4 = sld [smem:[#allocation39_spill]] }
  0x73   : > { %v1349_v13 = vld [vmem:[%s2175_s24 + $0x8] sm:$0xff]  ;;  %v1352_v14 = vld [vmem:[%s2175_s24 + $0x20] sm:$0xff]  ;;  %v1355_v15 = vld [vmem:[%s2175_s24 + $0x38] sm:$0xff] }
  0x74   : > { %592 = vmatpush.bf16.msra.mxu0 %v1366_v2  ;;  %1373 = vmatpush.bf16.msra.mxu1 %v1366_v2  ;;  %v1358_v16 = vld [vmem:[%s2175_s24 + $0x50] sm:$0xff]  ;;  %v1353_v18 = vld [vmem:[%s2175_s24 + $0x28] sm:$0xff]  ;;  %v1356_v19 = vld [vmem:[%s2175_s24 + $0x40] sm:$0xff] }
  0x75   : > { %1374 = vmatpush.bf16.msra.mxu2 %v1366_v2  ;;  %1375 = vmatpush.bf16.msra.mxu3 %v1366_v2  ;;  %v1350_v17 = vld [vmem:[%s2175_s24 + $0x10] sm:$0xff]  ;;  %v1359_v20 = vld [vmem:[%s2175_s24 + $0x58] sm:$0xff]  ;;  %s1368_s21 = smul.u32 48, %s2545_s15  ;;  %s962_s24 = sshll.u32 %s2210_s23, 4  ;;  %s2365_s24 = int_to_ptr.vmem [resolvable:$true] %s962_s24 }
  0x76   : > { %v2235_v21 = vld [vmem:[%s354_s12] ss:$0 sm:$0xff]  ;;  %s1344_s12 = sshll.u32 %s2546_s7, 3 }
  0x77   : > { %v660_v23 = vld [vmem:[#allocation2] sm:$0xff]  ;;  %s2321_s29 = sadd.s32 %s2546_s7, %s1368_s21  ;;  %s2549_s7 = sld [smem:[#allocation41_spill]] }
  0x78   : > { %593 = vmatpush.bf16.msra.mxu0 %v1365_v3  ;;  %1376 = vmatpush.bf16.msra.mxu1 %v1365_v3  ;;  %s1343_s10 = sshll.u32 %s2321_s29, 3  ;;  %s1341_s17 = sshll.u32 %s2321_s29, 2 }
  0x79   : > { %1377 = vmatpush.bf16.msra.mxu2 %v1365_v3  ;;  %1378 = vmatpush.bf16.msra.mxu3 %v1365_v3  ;;  %s944_s14 = scalar_lea.hbm %s2547_s2, %s1343_s10  ;;  %s925_s26 = scalar_lea.hbm %s2548_s4, %s1341_s17 }
  0x7a   : > { %s947_s13 = sshll.u32 %s944_s14, 4  ;;  %s926_s29 = sshll.u32 %s2206_s30, 4  ;;  %s2344_s13 = int_to_ptr.hbm [resolvable:$true] %s947_s13  ;;  %s2358_s29 = int_to_ptr.vmem [resolvable:$true] %s926_s29 }
  0x7b   : > { %s928_s10 = sshll.u32 %s925_s26, 4  ;;  %s2371_s17 = scalar_lea.sflag [#allocation13], %s341_s0  ;;  %s2361_s10 = int_to_ptr.hbm [resolvable:$true] %s928_s10 }
  0x7c   : > { %594 = vmatpush.bf16.msra.mxu0 %v1364_v4  ;;  %1379 = vmatpush.bf16.msra.mxu1 %v1364_v4 }
  0x7d   : > { %1380 = vmatpush.bf16.msra.mxu2 %v1364_v4  ;;  %1381 = vmatpush.bf16.msra.mxu3 %v1364_v4  ;;  %s2550_s11 = smov %s2549_s7  ;;  %s960_s21 = scalar_lea.hbm %s2549_s7, %s1344_s12 }
  0x7e   : > { %s964_s14 = sshll.u32 %s960_s21, 4  ;;  %s1693_s12 = sshra.s32 %s2344_s13, 4  ;;  %s2367_s14 = int_to_ptr.hbm [resolvable:$true] %s964_s14  ;;  %s1694_s12 = int_to_ptr.hbm [resolvable:$true] %s1693_s12 }
  0x7f   : > { %s1695_s6 = scalar_lea.hbm %s1694_s12, 192  ;;  %p1700_p0 = scmp.lt.s32.totalorder %s1694_s12, %s2547_s2 }
  0x80   : > { %595 = vmatpush.bf16.msra.mxu0 %v1363_v5  ;;  %1382 = vmatpush.bf16.msra.mxu1 %v1363_v5  ;;  %p1696_p7 = scmp.ne.s32.totalorder %s1694_s12, %s1695_s6 }
  0x81   : > { %1383 = vmatpush.bf16.msra.mxu2 %v1363_v5  ;;  %1384 = vmatpush.bf16.msra.mxu3 %v1363_v5 }
  0x82   : > { %p1697_p10 = pnand %p1696_p7, %p2125_p1 }
  0x84   : > { %596 = vmatpush.bf16.msra.mxu0 %v1362_v6  ;;  %1385 = vmatpush.bf16.msra.mxu1 %v1362_v6  ;;  %p1698_p13 = pneg %p1697_p10 }
  0x85   : > { %1386 = vmatpush.bf16.msra.mxu2 %v1362_v6  ;;  %1387 = vmatpush.bf16.msra.mxu3 %v1362_v6 }
  0x88   : > { %597 = vmatpush.bf16.msra.mxu0 %v1361_v7  ;;  %1388 = vmatpush.bf16.msra.mxu1 %v1361_v7 }
  0x89   : > { %1389 = vmatpush.bf16.msra.mxu2 %v1361_v7  ;;  %1390 = vmatpush.bf16.msra.mxu3 %v1361_v7 }
  0x8c   : > { %598 = vmatpush.bf16.msra.mxu0 %v1360_v8  ;;  %1391 = vmatpush.bf16.msra.mxu1 %v1360_v8 }
  0x8d   : > { %1392 = vmatpush.bf16.msra.mxu2 %v1360_v8  ;;  %1393 = vmatpush.bf16.msra.mxu3 %v1360_v8 }
  0x8f   : > { %599 = vmatmul.bf16.vlgmr.msra.gmra.mxu0 %v1348_v9  ;;  %614 = vmatmul.bf16.vlgmr.msra.gmra.mxu1 %v1351_v10 }
  0x90   : > { %629 = vmatmul.bf16.vlgmr.msra.gmra.mxu2 %v1354_v11  ;;  %644 = vmatmul.bf16.vlgmr.msra.gmra.mxu3 %v1357_v12 }
  0x9f   : > { %604 = vmatmul.bf16.gmra.mxu0 %v1349_v13  ;;  %619 = vmatmul.bf16.gmra.mxu1 %v1352_v14 }
  0xa0   : > { %634 = vmatmul.bf16.gmra.mxu2 %v1355_v15  ;;  %649 = vmatmul.bf16.gmra.mxu3 %v1358_v16 }
  0xaf   : > { %609 = vmatmul.bf16.gmra.mxu0 %v1350_v17  ;;  %624 = vmatmul.bf16.gmra.mxu1 %v1353_v18 }
  0xb0   : > { %639 = vmatmul.bf16.gmra.mxu2 %v1356_v19  ;;  %654 = vmatmul.bf16.gmra.mxu3 %v1359_v20 }
 0x10c   : > { %v600_v22 = vpop.f32.mrf.mxu0  ;;  %v615_v33 = vpop.f32.mrf.mxu1 }
 0x10d   : > { %v601_v24 = vadd.f32 %v2235_v21, %v600_v22  ;;  %v616_v62 = vadd.f32 %v2235_v21, %v615_v33 }
 0x10f   : > { %v661_v25 = vadd.f32 %v660_v23, %v601_v24 }
 0x111   : > { %vm662_vm0 = vcmp.gt.f32.partialorder %v661_v25, 1.0  ;;  %667 = vst [vmem:[%s2208_s5] sm:$0xff] %v661_v25 }
 0x112   : > { %v1269_v27 = vsel %vm662_vm0, 1.0, %v1902_v26  ;;  %v668_v31 = vsel %vm662_vm0, 0.0, %v661_v25 }
 0x113   : > { %v665_v28 = vpack.c.bf16 %v1269_v27, %v1269_v27  ;;  %v2254_v54 = vpop.f32.mrf.mxu2  ;;  %v2275_v22 = vpop.f32.mrf.mxu3 }
 0x114   : > { %v602_v29 = vpop.f32.mrf.mxu0  ;;  %v617_v41 = vpop.f32.mrf.mxu1 }
 0x115   : > { %666 = vst [vmem:[%s2206_s30] sm:$0xf] %v665_v28  ;;  %v603_v30 = vadd.f32 %v2235_v21, %v602_v29  ;;  %v618_v4 = vadd.f32 %v2235_v21, %v617_v41 }
 0x117   : > { %v669_v32 = vadd.f32 %v668_v31, %v603_v30 }
 0x119   : > { %vm670_vm1 = vcmp.gt.f32.partialorder %v669_v32, 1.0  ;;  %1272 = vst [vmem:[%s2208_s5 + $0x8] sm:$0xff] %v669_v32 }
 0x11a   : > { %v1270_v34 = vsel %vm670_vm1, 1.0, %v1902_v26  ;;  %v678_v38 = vsel %vm670_vm1, 0.0, %v669_v32 }
 0x11b   : > { %v673_v35 = vpack.c.bf16 %v1270_v34, %v1270_v34  ;;  %v632_v1 = vpop.f32.mrf.mxu2 }
 0x11c   : > { %v605_v36 = vpop.f32.mrf.mxu0  ;;  %v620_v50 = vpop.f32.mrf.mxu1 }
 0x11d   : > { %1271 = vst [vmem:[%s2206_s30 + $0x4] sm:$0xf] %v673_v35  ;;  %v606_v37 = vadd.f32 %v2235_v21, %v605_v36  ;;  %v621_v10 = vadd.f32 %v2235_v21, %v620_v50  ;;  %v631_v36 = vadd.f32 %v2235_v21, %v2254_v54 }
 0x11f   : > { %v679_v39 = vadd.f32 %v678_v38, %v606_v37 }
 0x121   : > { %1275 = vst [vmem:[%s2208_s5 + $0x10] sm:$0xff] %v679_v39  ;;  %vm680_vm2 = vcmp.gt.f32.partialorder %v679_v39, 1.0 }
 0x122   : > { %v1273_v40 = vsel %vm680_vm2, 1.0, %v1902_v26  ;;  %v688_v45 = vsel %vm680_vm2, 0.0, %v679_v39  ;;  %v647_v39 = vpop.f32.mrf.mxu3 }
 0x123   : > { %v683_v42 = vpack.c.bf16 %v1273_v40, %v1273_v40  ;;  %v635_v15 = vpop.f32.mrf.mxu2 }
 0x124   : > { %v607_v43 = vpop.f32.mrf.mxu0  ;;  %v622_v60 = vpop.f32.mrf.mxu1 }
 0x125   : > { %v608_v44 = vadd.f32 %v2235_v21, %v607_v43  ;;  %1274 = vst [vmem:[%s2206_s30 + $0x8] sm:$0xf] %v683_v42  ;;  %v623_v16 = vadd.f32 %v2235_v21, %v622_v60  ;;  %v633_v42 = vadd.f32 %v2235_v21, %v632_v1 }
 0x127   : > { %v689_v46 = vadd.f32 %v688_v45, %v608_v44 }
 0x129   : > { %1278 = vst [vmem:[%s2208_s5 + $0x18] sm:$0xff] %v689_v46  ;;  %vm690_vm3 = vcmp.gt.f32.partialorder %v689_v46, 1.0 }
 0x12a   : > { %v1276_v47 = vsel %vm690_vm3, 1.0, %v1902_v26  ;;  %v698_v52 = vsel %vm690_vm3, 0.0, %v689_v46 }
 0x12b   : > { %v693_v48 = vpack.c.bf16 %v1276_v47, %v1276_v47  ;;  %v637_v33 = vpop.f32.mrf.mxu2 }
 0x12c   : > { %v610_v49 = vpop.f32.mrf.mxu0  ;;  %v625_v9 = vpop.f32.mrf.mxu1  ;;  %v638_v54 = vadd.f32 %v2235_v21, %v637_v33 }
 0x12d   : > { %v611_v51 = vadd.f32 %v2235_v21, %v610_v49  ;;  %1277 = vst [vmem:[%s2206_s30 + $0xc] sm:$0xf] %v693_v48  ;;  %v626_v23 = vadd.f32 %v2235_v21, %v625_v9  ;;  %v636_v48 = vadd.f32 %v2235_v21, %v635_v15 }
 0x12f   : > { %v699_v53 = vadd.f32 %v698_v52, %v611_v51 }
 0x131   : > { %1281 = vst [vmem:[%s2208_s5 + $0x20] sm:$0xff] %v699_v53  ;;  %vm700_vm4 = vcmp.gt.f32.partialorder %v699_v53, 1.0 }
 0x132   : > { %v1279_v55 = vsel %vm700_vm4, 1.0, %v1902_v26  ;;  %v708_v59 = vsel %vm700_vm4, 0.0, %v699_v53  ;;  %v650_v53 = vpop.f32.mrf.mxu3 }
 0x133   : > { %v703_v56 = vpack.c.bf16 %v1279_v55, %v1279_v55  ;;  %v640_v47 = vpop.f32.mrf.mxu2 }
 0x134   : > { %v612_v57 = vpop.f32.mrf.mxu0  ;;  %v627_v27 = vpop.f32.mrf.mxu1 }
 0x135   : > { %v613_v58 = vadd.f32 %v2235_v21, %v612_v57  ;;  %1280 = vst [vmem:[%s2206_s30 + $0x10] sm:$0xf] %v703_v56  ;;  %v628_v30 = vadd.f32 %v2235_v21, %v627_v27 }
 0x137   : > { %v709_v61 = vadd.f32 %v708_v59, %v613_v58  ;;  %v641_v59 = vadd.f32 %v2235_v21, %v640_v47 }
 0x139   : > { %vm710_vm5 = vcmp.gt.f32.partialorder %v709_v61, 1.0  ;;  %1284 = vst [vmem:[%s2208_s5 + $0x28] sm:$0xff] %v709_v61 }
 0x13a   : > { %v1282_v63 = vsel %vm710_vm5, 1.0, %v1902_v26  ;;  %v718_v0 = vsel %vm710_vm5, 0.0, %v709_v61 }
 0x13b   : > { %v713_v2 = vpack.c.bf16 %v1282_v63, %v1282_v63  ;;  %v719_v3 = vadd.f32 %v718_v0, %v616_v62  ;;  %v642_v62 = vpop.f32.mrf.mxu2 }
 0x13c   : > { %v643_v1 = vadd.f32 %v2235_v21, %v642_v62 }
 0x13d   : > { %1283 = vst [vmem:[%s2206_s30 + $0x14] sm:$0xf] %v713_v2  ;;  %vm720_vm6 = vcmp.gt.f32.partialorder %v719_v3, 1.0 }
 0x13e   : > { %v1285_v5 = vsel %vm720_vm6, 1.0, %v1902_v26  ;;  %1287 = vst [vmem:[%s2208_s5 + $0x30] sm:$0xff] %v719_v3  ;;  %v728_v6 = vsel %vm720_vm6, 0.0, %v719_v3 }
 0x13f   : > { %v723_v7 = vpack.c.bf16 %v1285_v5, %v1285_v5  ;;  %v729_v8 = vadd.f32 %v728_v6, %v618_v4  ;;  %v652_v4 = vpop.f32.mrf.mxu3 }
 0x141   : > { %1286 = vst [vmem:[%s2206_s30 + $0x18] sm:$0xf] %v723_v7  ;;  %vm730_vm7 = vcmp.gt.f32.partialorder %v729_v8, 1.0  ;;  %v646_v7 = vadd.f32 %v2235_v21, %v2275_v22 }
 0x142   : > { %v1288_v11 = vsel %vm730_vm7, 1.0, %v1902_v26  ;;  %1290 = vst [vmem:[%s2208_s5 + $0x38] sm:$0xff] %v729_v8  ;;  %v738_v12 = vsel %vm730_vm7, 0.0, %v729_v8 }
 0x143   : > { %v733_v13 = vpack.c.bf16 %v1288_v11, %v1288_v11  ;;  %v739_v14 = vadd.f32 %v738_v12, %v621_v10  ;;  %v648_v12 = vadd.f32 %v2235_v21, %v647_v39 }
 0x145   : > { %1289 = vst [vmem:[%s2206_s30 + $0x1c] sm:$0xf] %v733_v13  ;;  %vm740_vm8 = vcmp.gt.f32.partialorder %v739_v14, 1.0 }
 0x146   : > { %v1291_v17 = vsel %vm740_vm8, 1.0, %v1902_v26  ;;  %1293 = vst [vmem:[%s2208_s5 + $0x40] sm:$0xff] %v739_v14  ;;  %v748_v18 = vsel %vm740_vm8, 0.0, %v739_v14 }
 0x147   : > { %v743_v19 = vpack.c.bf16 %v1291_v17, %v1291_v17  ;;  %v749_v20 = vadd.f32 %v748_v18, %v623_v16  ;;  %v655_v17 = vpop.f32.mrf.mxu3  ;;  %v651_v18 = vadd.f32 %v2235_v21, %v650_v53 }
 0x149   : > { %1292 = vst [vmem:[%s2206_s30 + $0x20] sm:$0xf] %v743_v19  ;;  %vm750_vm9 = vcmp.gt.f32.partialorder %v749_v20, 1.0 }
 0x14a   : > { %1296 = vst [vmem:[%s2208_s5 + $0x48] sm:$0xff] %v749_v20  ;;  %v1294_v24 = vsel %vm750_vm9, 1.0, %v1902_v26  ;;  %v758_v25 = vsel %vm750_vm9, 0.0, %v749_v20 }
 0x14b   : > { %v753_v28 = vpack.c.bf16 %v1294_v24, %v1294_v24  ;;  %v759_v29 = vadd.f32 %v758_v25, %v626_v23  ;;  %v653_v24 = vadd.f32 %v2235_v21, %v652_v4 }
 0x14d   : > { %1295 = vst [vmem:[%s2206_s30 + $0x24] sm:$0xf] %v753_v28  ;;  %vm760_vm10 = vcmp.gt.f32.partialorder %v759_v29, 1.0 }
 0x14e   : > { %1299 = vst [vmem:[%s2208_s5 + $0x50] sm:$0xff] %v759_v29  ;;  %v1297_v31 = vsel %vm760_vm10, 1.0, %v1902_v26  ;;  %v768_v32 = vsel %vm760_vm10, 0.0, %v759_v29 }
 0x14f   : > { %v763_v34 = vpack.c.bf16 %v1297_v31, %v1297_v31  ;;  %v769_v35 = vadd.f32 %v768_v32, %v628_v30  ;;  %v656_v30 = vadd.f32 %v2235_v21, %v655_v17  ;;  %v657_v33 = vpop.f32.mrf.mxu3 }
 0x151   : > { %1298 = vst [vmem:[%s2206_s30 + $0x28] sm:$0xf] %v763_v34  ;;  %vm770_vm11 = vcmp.gt.f32.partialorder %v769_v35, 1.0 }
 0x152   : > { %v1300_v37 = vsel %vm770_vm11, 1.0, %v1902_v26  ;;  %1302 = vst [vmem:[%s2208_s5 + $0x58] sm:$0xff] %v769_v35  ;;  %v778_v38 = vsel %vm770_vm11, 0.0, %v769_v35 }
 0x153   : > { %v773_v40 = vpack.c.bf16 %v1300_v37, %v1300_v37  ;;  %v779_v41 = vadd.f32 %v778_v38, %v631_v36  ;;  %v658_v36 = vadd.f32 %v2235_v21, %v657_v33 }
 0x155   : > { %1301 = vst [vmem:[%s2206_s30 + $0x2c] sm:$0xf] %v773_v40  ;;  %vm780_vm12 = vcmp.gt.f32.partialorder %v779_v41, 1.0 }
 0x156   : > { %1305 = vst [vmem:[%s2208_s5 + $0x60] sm:$0xff] %v779_v41  ;;  %v1303_v43 = vsel %vm780_vm12, 1.0, %v1902_v26  ;;  %v788_v44 = vsel %vm780_vm12, 0.0, %v779_v41 }
 0x157   : > { %v783_v45 = vpack.c.bf16 %v1303_v43, %v1303_v43  ;;  %v789_v46 = vadd.f32 %v788_v44, %v633_v42 }
 0x159   : > { %1304 = vst [vmem:[%s2206_s30 + $0x30] sm:$0xf] %v783_v45  ;;  %vm790_vm13 = vcmp.gt.f32.partialorder %v789_v46, 1.0 }
 0x15a   : > { %v1306_v49 = vsel %vm790_vm13, 1.0, %v1902_v26  ;;  %1308 = vst [vmem:[%s2208_s5 + $0x68] sm:$0xff] %v789_v46  ;;  %v798_v50 = vsel %vm790_vm13, 0.0, %v789_v46 }
 0x15b   : > { %v793_v51 = vpack.c.bf16 %v1306_v49, %v1306_v49  ;;  %v799_v52 = vadd.f32 %v798_v50, %v636_v48 }
 0x15d   : > { %1307 = vst [vmem:[%s2206_s30 + $0x34] sm:$0xf] %v793_v51  ;;  %vm800_vm14 = vcmp.gt.f32.partialorder %v799_v52, 1.0 }
 0x15e   : > { %1311 = vst [vmem:[%s2208_s5 + $0x70] sm:$0xff] %v799_v52  ;;  %v1309_v55 = vsel %vm800_vm14, 1.0, %v1902_v26  ;;  %v808_v56 = vsel %vm800_vm14, 0.0, %v799_v52 }
 0x15f   : > { %v803_v57 = vpack.c.bf16 %v1309_v55, %v1309_v55  ;;  %v809_v58 = vadd.f32 %v808_v56, %v638_v54 }
 0x161   : > { %1310 = vst [vmem:[%s2206_s30 + $0x38] sm:$0xf] %v803_v57  ;;  %vm810_vm15 = vcmp.gt.f32.partialorder %v809_v58, 1.0 }
 0x162   : > { %1314 = vst [vmem:[%s2208_s5 + $0x78] sm:$0xff] %v809_v58  ;;  %v1312_v60 = vsel %vm810_vm15, 1.0, %v1902_v26  ;;  %v818_v61 = vsel %vm810_vm15, 0.0, %v809_v58 }
 0x163   : > { %v813_v63 = vpack.c.bf16 %v1312_v60, %v1312_v60  ;;  %v819_v0 = vadd.f32 %v818_v61, %v641_v59 }
 0x165   : > { %1313 = vst [vmem:[%s2206_s30 + $0x3c] sm:$0xf] %v813_v63  ;;  %vm820_vm0 = vcmp.gt.f32.partialorder %v819_v0, 1.0 }
 0x166   : > { %1317 = vst [vmem:[%s2208_s5 + $0x80] sm:$0xff] %v819_v0  ;;  %v1315_v2 = vsel %vm820_vm0, 1.0, %v1902_v26  ;;  %v828_v3 = vsel %vm820_vm0, 0.0, %v819_v0 }
 0x167   : > { %v823_v5 = vpack.c.bf16 %v1315_v2, %v1315_v2  ;;  %v829_v6 = vadd.f32 %v828_v3, %v643_v1 }
 0x169   : > { %1316 = vst [vmem:[%s2206_s30 + $0x40] sm:$0xf] %v823_v5  ;;  %vm830_vm1 = vcmp.gt.f32.partialorder %v829_v6, 1.0 }
 0x16a   : > { %v1318_v8 = vsel %vm830_vm1, 1.0, %v1902_v26  ;;  %1320 = vst [vmem:[%s2208_s5 + $0x88] sm:$0xff] %v829_v6  ;;  %v838_v9 = vsel %vm830_vm1, 0.0, %v829_v6 }
 0x16b   : > { %v833_v10 = vpack.c.bf16 %v1318_v8, %v1318_v8  ;;  %v839_v11 = vadd.f32 %v838_v9, %v646_v7 }
 0x16d   : > { %1319 = vst [vmem:[%s2206_s30 + $0x44] sm:$0xf] %v833_v10  ;;  %vm840_vm2 = vcmp.gt.f32.partialorder %v839_v11, 1.0 }
 0x16e   : > { %1323 = vst [vmem:[%s2208_s5 + $0x90] sm:$0xff] %v839_v11  ;;  %v1321_v13 = vsel %vm840_vm2, 1.0, %v1902_v26  ;;  %v848_v14 = vsel %vm840_vm2, 0.0, %v839_v11 }
 0x16f   : > { %v843_v15 = vpack.c.bf16 %v1321_v13, %v1321_v13  ;;  %v849_v16 = vadd.f32 %v848_v14, %v648_v12 }
 0x171   : > { %1322 = vst [vmem:[%s2206_s30 + $0x48] sm:$0xf] %v843_v15  ;;  %vm850_vm3 = vcmp.gt.f32.partialorder %v849_v16, 1.0 }
 0x172   : > { %v1324_v19 = vsel %vm850_vm3, 1.0, %v1902_v26  ;;  %1326 = vst [vmem:[%s2208_s5 + $0x98] sm:$0xff] %v849_v16  ;;  %v858_v20 = vsel %vm850_vm3, 0.0, %v849_v16 }
 0x173   : > { %v853_v22 = vpack.c.bf16 %v1324_v19, %v1324_v19  ;;  %v859_v23 = vadd.f32 %v858_v20, %v651_v18 }
 0x175   : > { %1325 = vst [vmem:[%s2206_s30 + $0x4c] sm:$0xf] %v853_v22  ;;  %vm860_vm4 = vcmp.gt.f32.partialorder %v859_v23, 1.0 }
 0x176   : > { %1329 = vst [vmem:[%s2208_s5 + $0xa0] sm:$0xff] %v859_v23  ;;  %v1327_v25 = vsel %vm860_vm4, 1.0, %v1902_v26  ;;  %v868_v27 = vsel %vm860_vm4, 0.0, %v859_v23 }
 0x177   : > { %v863_v28 = vpack.c.bf16 %v1327_v25, %v1327_v25  ;;  %v869_v29 = vadd.f32 %v868_v27, %v653_v24 }
 0x179   : > { %1328 = vst [vmem:[%s2206_s30 + $0x50] sm:$0xf] %v863_v28  ;;  %vm870_vm5 = vcmp.gt.f32.partialorder %v869_v29, 1.0 }
 0x17a   : > { %1332 = vst [vmem:[%s2208_s5 + $0xa8] sm:$0xff] %v869_v29  ;;  %v1330_v31 = vsel %vm870_vm5, 1.0, %v1902_v26  ;;  %v878_v32 = vsel %vm870_vm5, 0.0, %v869_v29 }
 0x17b   : > { %v873_v34 = vpack.c.bf16 %v1330_v31, %v1330_v31  ;;  %v879_v35 = vadd.f32 %v878_v32, %v656_v30 }
 0x17d   : > { %1331 = vst [vmem:[%s2206_s30 + $0x54] sm:$0xf] %v873_v34  ;;  %vm880_vm6 = vcmp.gt.f32.partialorder %v879_v35, 1.0 }
 0x17e   : > { %1335 = vst [vmem:[%s2208_s5 + $0xb0] sm:$0xff] %v879_v35  ;;  %v1333_v37 = vsel %vm880_vm6, 1.0, %v1902_v26  ;;  %v888_v38 = vsel %vm880_vm6, 0.0, %v879_v35 }
 0x17f   : > { %v883_v39 = vpack.c.bf16 %v1333_v37, %v1333_v37  ;;  %v889_v40 = vadd.f32 %v888_v38, %v658_v36 }
 0x181   : > { %1334 = vst [vmem:[%s2206_s30 + $0x58] sm:$0xf] %v883_v39  ;;  %vm890_vm7 = vcmp.gt.f32.partialorder %v889_v40, 1.0 }
 0x182   : > { %v1336_v21 = vsel %vm890_vm7, 1.0, %v1902_v26  ;;  %1338 = vst [vmem:[%s2208_s5 + $0xb8] sm:$0xff] %v889_v40  ;;  %v898_v41 = vsel %vm890_vm7, 0.0, %v889_v40  ;;  %s1699_s5 = scalar_lea.hbm %s2547_s2, 768 }
 0x183   : > { %v893_v42 = vpack.c.bf16 %v1336_v21, %v1336_v21  ;;  %899 = vst [vmem:[#allocation2] sm:$0xff] %v898_v41  ;;  %p1701_p12 = scmp.lt.s32.totalorder %s1699_s5, %s1695_s6 }
 0x185   : > { %p1702_p8 = por %p1701_p12, %p1700_p0 }
 0x187   : > { %p1703_p9 = pnand %p1702_p8, %p1698_p13 }
 0x189   : > { %1706 = shalt.err (!%p1703_p9)
}
 0x18a   : > { %s1903_s19 = smov 128   ;;  %s1904_s7 = smov 256   ;;  %900 = vst [vmem:[%s2210_s23] sm:$0xff] %v889_v40 }
 0x18b   : > { %s1905_s21 = smov 8   ;;  %1337 = vst [vmem:[%s2206_s30 + $0x5c] sm:$0xf] %v893_v42  ;;  %s1721_s12 = sshra.s32 %s2367_s14, 4  ;;  %s1722_s12 = int_to_ptr.hbm [resolvable:$true] %s1721_s12 }
 0x18c   : > { %1407 = dma.vmem_to_hbm [thread:$0]  (%p2125_p1), %s2342_s16, 3072, %s2344_s13, %s2371_s17, %s1903_s19, %s1904_s7, %s1905_s21  }
 0x18d   : > { %s1723_s6 = scalar_lea.hbm %s1722_s12, 8  ;;  %s1727_s5 = scalar_lea.hbm %s2550_s11, 16 }
 0x18e   : > { %p1724_p11 = scmp.ne.s32.totalorder %s1722_s12, %s1723_s6  ;;  %p1728_p6 = scmp.lt.s32.totalorder %s1722_s12, %s2550_s11 }
 0x18f   : > { %p1729_p7 = scmp.lt.s32.totalorder %s1727_s5, %s1723_s6 }
 0x190   : > { %p1725_p4 = pnand %p1724_p11, %p2134_p2 }
 0x191   : > { %p1730_p10 = por %p1729_p7, %p1728_p6 }
 0x192   : > { %p1726_p3 = pneg %p1725_p4 }
 0x194   : > { %p1731_p13 = pnand %p1730_p10, %p1726_p3 }
 0x196   : > { %1734 = shalt.err (!%p1731_p13)
}
 0x197   : > { %1408 = dma.vmem_to_hbm [thread:$0]  (%p2134_p2), %s2365_s24, 128, %s2367_s14, %s2371_s17  }
 0x198   : > { %s902_s30 = scalar_lea.sflag [#allocation5], %s2202_s27  ;;  %s1749_s23 = sshra.s32 %s2361_s10, 4  ;;  %s1750_s23 = int_to_ptr.hbm [resolvable:$true] %s1749_s23 }
 0x199   : > { %s1751_s16 = scalar_lea.hbm %s1750_s23, 96  ;;  %s1755_s21 = scalar_lea.hbm %s2548_s4, 384 }
 0x19a   : > { %p1752_p0 = scmp.ne.s32.totalorder %s1750_s23, %s1751_s16  ;;  %p1756_p9 = scmp.lt.s32.totalorder %s1750_s23, %s2548_s4 }
 0x19b   : > { %p1757_p11 = scmp.lt.s32.totalorder %s1755_s21, %s1751_s16 }
 0x19c   : > { %p1753_p12 = pnand %p1752_p0, %p2125_p1 }
 0x19d   : > { %p1758_p4 = por %p1757_p11, %p1756_p9 }
 0x19e   : > { %p1754_p8 = pneg %p1753_p12 }
 0x1a0   : > { %p1759_p3 = pnand %p1758_p4, %p1754_p8 }
 0x1a2   : > { %1762 = shalt.err (!%p1759_p3)
}
 0x1a3   : > { %s1906_s27 = smov 64   ;;  %s1907_s24 = smov 4  }
 0x1a4   : > { %1406 = dma.vmem_to_hbm [thread:$0]  (%p2125_p1), %s2358_s29, 1536, %s2361_s10, %s902_s30, %s1906_s27, %s1903_s19, %s1907_s24  }
 0x1a5 PF: > { %s2552_s14 = sld [smem:[#allocation27_spill]] }
 0x1a6   : > { %s2553_s17 = sld [smem:[#allocation21_spill]] }
 0x1ab   : > { %p1436_p2 = scmp.ge.s32.totalorder %s2552_s14, 2 }
 0x1ac   : > { %s976_s1 = sand.u32 1, %s2553_s17  }
 0x1ad   : > { %p1426_p6 = pnand %p1436_p2, %p2141_p5  ;;  %s977_s26 = scalar_lea.sflag [#allocation5], %s976_s1 }
 0x1af   : > { %p1427_p7 = pneg %p1426_p6 }
 0x1b1   : > { %1832 = dma.done.wait (%p1427_p7), %s977_s26, 1536  }
 0x1b2   : > { %1834 = vsyncadd (%p1427_p7), %s977_s26, 4294965760  ;;  %s2555_s5 = sadd.s32 4294967294, %s2552_s14  }
 0x1b3   : > { %s986_s18 = sand.u32 1, %s2555_s5  }
 0x1b4   : > { %s987_s15 = scalar_lea.sflag [#allocation13], %s986_s18 }
 0x1b5   : > { %1836 = dma.done.wait (%p1427_p7), %s987_s15, 3072  }
 0x1b6   : > { %1838 = vsyncadd (%p1427_p7), %s987_s15, 4294964224  ;;  %s2556_s20 = sld [smem:[#allocation28_spill]] }
 0x1bc   : > { %p2557_p1 = scmp.ne.s32.totalorder %s2556_s20, 0 }
 0x1be   : > { %p1432_p10 = pnand %p1436_p2, %p2557_p1 }
 0x1c0   : > { %p1433_p13 = pneg %p1432_p10 }
 0x1c2   : > { %1840 = dma.done.wait (%p1433_p13), %s987_s15, 128  }
 0x1c3   : > { %1842 = vsyncadd (%p1433_p13), %s987_s15, 4294967168  ;;  %s32_s10 = sadd.s32 1, %s2552_s14   ;;  %s2559_s19 = sld [smem:[#allocation22_spill]] }
 0x1c4   : > { %p2428_p0 = scmp.ge.s32.totalorder %s32_s10, 6   ;;  %s2560_s23 = sld [smem:[#allocation33_spill]] }
 0x1c5   : > { %s2561_s30 = sld [smem:[#allocation23_spill]]  ;;  %s2568_s21 = smov %s1849_s22 }
 0x1c6   : > { %s2562_s26 = sld [smem:[#allocation32_spill]]  ;;  %s2570_s24 = smov %s1861_s25 }
 0x1c7   : > { %s2563_s16 = sld [smem:[#allocation24_spill]]  ;;  %s2572_s27 = smov %s1873_s28 }
 0x1c8   : > { %s2564_s13 = sld [smem:[#allocation31_spill]]  ;;  %s2576_s7 = smov %s1893_s9 }
 0x1c9   : > { %s2565_s0 = sld [smem:[#allocation29_spill]]  ;;  %s2569_s22 = smov %s2559_s19 }
 0x1ca   : > { %s2566_s12 = sld [smem:[#allocation30_spill]] }
 0x1cb   : > { %s2571_s25 = smov %s2561_s30  ;;  %s2575_s30 = smov %s1889_s8 }
 0x1cc   :  { %31 = sbr.rel (!%p2428_p0) target bundleno = 23 (0x17), region = 200 }
 0x1cd   : > { %s2573_s28 = smov %s2563_s16 }
 0x1ce   : > { %s2574_s29 = smov %s2564_s13 }
 0x1cf   : > { %s2577_s8 = smov %s2565_s0 }
 0x1d0   : > { %s2578_s9 = smov %s2566_s12 }
 0x1d1   :  { %1003 = vsyncpa [#allocation4], 1 }
 0x1d2   :  { %1005 = vsyncpa [#allocation4 + $0x1], 1 }
 0x1d3   :  { %1006 = vsyncpa [#allocation7], 1 }
 0x1d4   :  { %1008 = vsyncpa [#allocation7 + $0x1], 1 }
 0x1d5   :  { %1009 = vsyncpa [#allocation10], 1 }
 0x1d6   :  { %1011 = vsyncpa [#allocation10 + $0x1], 1 }
 0x1d7   :  { %1012 = vsyncpa [#allocation5], 1 }
 0x1d8   :  { %1014 = vsyncpa [#allocation5 + $0x1], 1 }
 0x1d9   :  { %1015 = vsyncpa [#allocation13], 1 }
 0x1da   :  { %1017 = vsyncpa [#allocation13 + $0x1], 1 }

</bundles_post_ra>
